<compile_context>
chip_gen: v6e
topology: v6e:2x2x1
jax: 0.10.0
libtpu: 0.0.40
codegen_flags: <defaults>
</compile_context>

<pallas_src>
import functools
import math

import jax
import jax.numpy as jnp
from jax.experimental import pallas as pl
from jax.experimental.pallas import tpu as pltpu

EPS = 1e-5  # nn.BatchNorm2d default eps


def _default_vmem_limit():
    """Generation-aware scoped-VMEM budget (v5e/v6e ~128 MiB, v7x 64 MiB)."""
    try:
        cap = int(getattr(pltpu.get_tpu_info(), "vmem_capacity_bytes", 0))
    except Exception:
        cap = 0
    if cap <= 0:
        cap = 64 * 1024 * 1024          # conservative fallback (v7x per-core)
    return int(min(cap * 3 // 4, 100 * 1024 * 1024))


VMEM_LIMIT = _default_vmem_limit()


# ---------------------------------------------------------------------------
# Kernels
# ---------------------------------------------------------------------------
def _conv_stats_kernel(*refs, fused_bn: bool, B: int, H: int, WC: int):
    """Per grid step (B images): [optional fused BN+ReLU prelude] -> build the
    stacked zero-halo slab in VMEM -> 3x3 'same' conv as 3 lane-dense MXU
    matmuls over all B images at once -> conv output + per-step BN partials.

    refs (fused_bn=True):
      x_ref     (B, H, WC)       input slab (for stage 2: raw conv1 output)
      w_ref     (3, WC, WC)      halo-trimmed block-Toeplitz conv weights
      scale_ref (1, WC)          previous-stage BN scale (tiled over W)
      shift_ref (1, WC)          previous-stage BN shift
      y_ref     (B, H, WC)       conv output (pre-BN), store dtype
      s_ref     (1, 1, WC)       per-step partial sums (reduced over B and H)
      ss_ref    (1, 1, WC)       per-step partial sums of squares
      xp_ref    (B*(H+2), WC)    VMEM scratch: B padded images, stride H+2
    """
    if fused_bn:
        x_ref, w_ref, scale_ref, shift_ref, y_ref, s_ref, ss_ref, xp_ref = refs
        scale = scale_ref[...]
        shift = shift_ref[...]
    else:
        x_ref, w_ref, y_ref, s_ref, ss_ref, xp_ref = refs

    S = H + 2
    cdtype = xp_ref.dtype
    zero_row = jnp.zeros((1, WC), cdtype)

    # Build the stacked padded slab.  Only the 2 halo rows per image are
    # zeroed each step (the interior is fully overwritten), so there is no
    # full-scratch zero sweep on the scarce store slot.
    for b in range(B):
        base = b * S
        xb = x_ref[b].astype(jnp.float32)                       # (H, WC)
        if fused_bn:
            # Fused BatchNorm (precomputed scale/shift) + ReLU of stage 1.
            xb = jnp.maximum(xb * scale + shift, 0.0)
        xp_ref[pl.ds(base, 1), :] = zero_row                    # top halo
        xp_ref[pl.ds(base + 1, H), :] = xb.astype(cdtype)       # interior
        xp_ref[pl.ds(base + H + 1, 1), :] = zero_row            # bottom halo

    # 3x3 conv: dx and the W output position are folded into the contraction /
    # output-lane dims (block-Toeplitz weights with K = W*C, halo trimmed);
    # dy is folded into 3 matmuls over contiguous row windows of the stacked
    # slab -> M = B*(H+2)-2 rows per MXU push.
    # TODO(synk): for very large W*C (Toeplitz weight > ~1/4 of VMEM) fall
    # back to a per-tap K=C formulation / pl.Buffered(1) weight instead.
    M = B * S - 2
    acc = jnp.zeros((M, WC), jnp.float32)
    for dy in range(3):
        acc += jnp.dot(xp_ref[pl.ds(dy, M), :], w_ref[dy],
                       preferred_element_type=jnp.float32)

    # Extract the H valid rows per image (rows computed at inter-image halo
    # positions are discarded) and accumulate BN partial statistics from the
    # f32 accumulator.  The tiny per-channel reduction over grid steps / W is
    # wrapper glue.
    s = jnp.zeros((1, WC), jnp.float32)
    ss = jnp.zeros((1, WC), jnp.float32)
    for b in range(B):
        ab = acc[b * S:b * S + H]
        y_ref[b] = ab.astype(y_ref.dtype)
        s = s + jnp.sum(ab, axis=0, keepdims=True)
        ss = ss + jnp.sum(ab * ab, axis=0, keepdims=True)
    s_ref[0] = s
    ss_ref[0] = ss


def _finalize_kernel(y_ref, scale_ref, shift_ref, res_ref, out_ref):
    """Per grid step (B images): BN2 (precomputed) -> ReLU -> +shortcut -> ReLU."""
    y = y_ref[...].astype(jnp.float32)
    y = jnp.maximum(y * scale_ref[...] + shift_ref[...], 0.0)
    y = y + res_ref[...].astype(jnp.float32)
    out_ref[...] = jnp.maximum(y, 0.0).astype(out_ref.dtype)


# ---------------------------------------------------------------------------
# pallas_call wrappers
# ---------------------------------------------------------------------------
def _conv_stats_call(x3, wbig, scale_row, shift_row, b_tile,
                     compute_dtype, store_dtype):
    N, H, WC = x3.shape
    steps = N // b_tile
    fused = scale_row is not None
    kern = functools.partial(_conv_stats_kernel, fused_bn=fused,
                             B=b_tile, H=H, WC=WC)

    img_spec = pl.BlockSpec((b_tile, H, WC), lambda i: (i, 0, 0))
    stat_spec = pl.BlockSpec((1, 1, WC), lambda i: (i, 0, 0))
    vec_spec = pl.BlockSpec((1, WC), lambda i: (0, 0))
    # Grid-invariant weight block (constant index_map -> fetched once per core).
    w_spec = pl.BlockSpec(wbig.shape, lambda i: (0, 0, 0))

    inputs = [x3, wbig]
    in_specs = [img_spec, w_spec]
    if fused:
        inputs += [scale_row, shift_row]
        in_specs += [vec_spec, vec_spec]

    return pl.pallas_call(
        kern,
        out_shape=(
            jax.ShapeDtypeStruct((N, H, WC), store_dtype),       # conv output
            jax.ShapeDtypeStruct((steps, 1, WC), jnp.float32),   # partial sum
            jax.ShapeDtypeStruct((steps, 1, WC), jnp.float32),   # partial sumsq
        ),
        grid=(steps,),
        in_specs=in_specs,
        out_specs=(img_spec, stat_spec, stat_spec),
        scratch_shapes=[pltpu.VMEM((b_tile * (H + 2), WC), compute_dtype)],
        compiler_params=pltpu.CompilerParams(
            dimension_semantics=("parallel",),
            vmem_limit_bytes=VMEM_LIMIT),
    )(*inputs)


def _finalize_call(y3, scale_row, shift_row, res3, b_tile, out_dtype):
    N, H, WC = y3.shape
    steps = N // b_tile
    img_spec = pl.BlockSpec((b_tile, H, WC), lambda i: (i, 0, 0))
    vec_spec = pl.BlockSpec((1, WC), lambda i: (0, 0))
    return pl.pallas_call(
        _finalize_kernel,
        out_shape=jax.ShapeDtypeStruct((N, H, WC), out_dtype),
        grid=(steps,),
        in_specs=[img_spec, vec_spec, vec_spec, img_spec],
        out_specs=img_spec,
        compiler_params=pltpu.CompilerParams(
            dimension_semantics=("parallel",),
            vmem_limit_bytes=VMEM_LIMIT),
    )(y3, scale_row, shift_row, res3)


# ---------------------------------------------------------------------------
# Wrapper glue (layout / tiling decisions + tiny per-channel reductions)
# ---------------------------------------------------------------------------
def _lane_dense_channels(C, W):
    """Smallest C' >= C with W*C' a multiple of 128 (unmasked vector stores,
    full MXU columns), capped at 2x growth; otherwise keep C."""
    if (W * C) % 128 == 0:
        return C
    step = 128 // math.gcd(W, 128)
    Cp = -(-C // step) * step
    return Cp if Cp <= 2 * C else C


def _pick_b_tile(N, H, WC, compute_dtype, store_dtype, weight_bytes):
    """Largest batch tile that (a) divides N, (b) keeps >= 2 grid steps so the
    'parallel' axis covers both v7x TensorCores, and (c) fits the VMEM budget
    (halo slab + f32 accumulator + double-buffered activation blocks)."""
    cb = jnp.dtype(compute_dtype).itemsize
    sb = jnp.dtype(store_dtype).itemsize
    budget = VMEM_LIMIT * 3 // 5 - 2 * weight_bytes   # weights double-buffered
    best = 1
    for b in range(1, N + 1):
        if N % b:
            continue
        if N >= 2 and N // b < 2:
            continue
        if b * H > 1024:                 # cap MXU M / accumulator rows
            continue
        rows = b * (H + 2)
        est = (rows * WC * cb            # halo slab scratch
               + rows * WC * 4           # f32 accumulator (vregs / spill)
               + 4 * b * H * WC * sb)    # double-buffered in + out act blocks
        if est <= budget:
            best = max(best, b)
    return best


def _toeplitz_conv_weights(w_hwio, W):
    """Fold (dx, ci) and the W output position into a block-Toeplitz matrix
    with the zero W-halo columns trimmed.

    Returns (3, W*Cin, W*Cout):
      out[dy, wi*Cin + ci, wo*Cout + co] = w_hwio[dy, wi - wo + 1, ci, co]
      (zero when |wi - wo| > 1),
    so the 3x3 'same' conv becomes  sum_dy  slab[dy : dy + H, :] @ out[dy]
    on rows of a vertically zero-padded (H+2, W*Cin) image slab.
    """
    kh, kw, cin, cout = w_hwio.shape
    eye_w = jnp.eye(W, dtype=w_hwio.dtype)
    mats = []
    for dy in range(kh):
        m = jnp.zeros(((W + kw - 1) * cin, W * cout), w_hwio.dtype)
        for dx in range(kw):
            m = m.at[dx * cin:(dx + W) * cin, :].add(
                jnp.kron(eye_w, w_hwio[dy, dx]))
        mats.append(m[cin:(W + 1) * cin, :])   # trim all-zero W-halo rows
    return jnp.stack(mats, axis=0)


def _bn_scale_shift(psum, psumsq, gamma, beta, count, W, C):
    """Per-channel BN scale/shift from per-step partial sums, tiled to the
    lane-dense (1, W*C) layout.  Training-mode (batch stats, biased var)."""
    s = psum.reshape(-1, W, C).sum(axis=(0, 1))
    ss = psumsq.reshape(-1, W, C).sum(axis=(0, 1))
    mean = s / count
    var = jnp.maximum(ss / count - mean * mean, 0.0)
    scale = gamma.reshape(-1) * jax.lax.rsqrt(var + EPS)
    shift = beta.reshape(-1) - mean * scale
    return jnp.tile(scale, W)[None, :], jnp.tile(shift, W)[None, :]


def _pad_last(a, target):
    pad = target - a.shape[-1]
    if pad == 0:
        return a
    widths = [(0, 0)] * (a.ndim - 1) + [(0, pad)]
    return jnp.pad(a, widths)


def _pad_conv_w(w_hwio, target):
    kh, kw, cin, cout = w_hwio.shape
    return jnp.pad(w_hwio,
                   ((0, 0), (0, 0), (0, target - cin), (0, target - cout)))


@functools.partial(jax.jit, static_argnames=("compute_dtype", "store_dtype"))
def resblock_forward(x_nchw, params, compute_dtype=jnp.float32,
                     store_dtype=jnp.bfloat16):
    """Forward pass of ResBlock; input/output are NCHW like PyTorch.

    compute_dtype: MXU operand dtype (f32 or bf16; accumulation always f32).
    store_dtype:   dtype of the inter-stage HBM activations y1/y2 (bf16 by
                   default to halve pipeline HBM traffic; BN statistics are
                   always taken from the f32 accumulator in-kernel).
    """
    N, C, H, W = x_nchw.shape
    # Lane-densify: zero-pad channels (when cheap) so W*C is a multiple of 128.
    Cp = _lane_dense_channels(C, W)
    WC = W * Cp
    count = N * H * W     # elements per channel for batch statistics

    x_nhwc = _pad_last(jnp.transpose(x_nchw, (0, 2, 3, 1)), Cp)
    x3 = x_nhwc.reshape(N, H, WC).astype(store_dtype)

    # Conv biases are intentionally dropped: training-mode BatchNorm with
    # batch statistics exactly cancels any per-channel additive constant.
    wbig1 = _toeplitz_conv_weights(_pad_conv_w(params["w1"], Cp), W)
    wbig2 = _toeplitz_conv_weights(_pad_conv_w(params["w2"], Cp), W)
    wbig1 = wbig1.astype(compute_dtype)
    wbig2 = wbig2.astype(compute_dtype)
    g1, be1 = _pad_last(params["g1"], Cp), _pad_last(params["be1"], Cp)
    g2, be2 = _pad_last(params["g2"], Cp), _pad_last(params["be2"], Cp)

    weight_bytes = int(wbig1.size) * jnp.dtype(compute_dtype).itemsize
    b_tile = _pick_b_tile(N, H, WC, compute_dtype, store_dtype, weight_bytes)

    # Stage 1: conv1 + partial BN1 stats (no residual / zeros DMA).
    y1, s1, ss1 = _conv_stats_call(x3, wbig1, None, None, b_tile,
                                   compute_dtype, store_dtype)
    sc1, sh1 = _bn_scale_shift(s1, ss1, g1, be1, count, W, Cp)

    # Stage 2 (fused): BN1 + ReLU + conv2 + partial BN2 stats.
    y2, s2, ss2 = _conv_stats_call(y1, wbig2, sc1, sh1, b_tile,
                                   compute_dtype, store_dtype)
    sc2, sh2 = _bn_scale_shift(s2, ss2, g2, be2, count, W, Cp)

    # Finalize: BN2 + ReLU + identity shortcut + ReLU.
    out3 = _finalize_call(y2, sc2, sh2, x3, b_tile, jnp.float32)
    out = out3.reshape(N, H, W, Cp)[..., :C]
    return jnp.transpose(out, (0, 3, 1, 2))


# ---------------------------------------------------------------------------
# Pure-JAX reference (faithful to the PyTorch module, incl. conv biases)
# ---------------------------------------------------------------------------
def resblock_reference(x_nchw, params):
    def conv(x, w, b):
        y = jax.lax.conv_general_dilated(
            x, w, window_strides=(1, 1), padding="SAME",
            dimension_numbers=("NHWC", "HWIO", "NHWC"))
        return y + b.reshape(1, 1, 1, -1)

    def bn(x, g, be):
        mean = jnp.mean(x, axis=(0, 1, 2), keepdims=True)
        var = jnp.mean((x - mean) ** 2, axis=(0, 1, 2), keepdims=True)
        return ((x - mean) * jax.lax.rsqrt(var + EPS) * g.reshape(1, 1, 1, -1)
                + be.reshape(1, 1, 1, -1))

    x = jnp.transpose(x_nchw, (0, 2, 3, 1))
    sc = x
    y = jnp.maximum(bn(conv(x, params["w1"], params["b1"]),
                       params["g1"], params["be1"]), 0.0)
    y = jnp.maximum(bn(conv(y, params["w2"], params["b2"]),
                       params["g2"], params["be2"]), 0.0)
    y = jnp.maximum(y + sc, 0.0)
    return jnp.transpose(y, (0, 3, 1, 2))


def init_params(key, cin, cout):
    ks = jax.random.split(key, 8)
    scale1 = 1.0 / jnp.sqrt(cin * 9.0)
    scale2 = 1.0 / jnp.sqrt(cout * 9.0)
    # Conv weights created as PyTorch (Cout, Cin, 3, 3), stored HWIO.
    w1 = jax.random.uniform(ks[0], (cout, cin, 3, 3), jnp.float32, -scale1, scale1)
    w2 = jax.random.uniform(ks[1], (cout, cout, 3, 3), jnp.float32, -scale2, scale2)
    return {
        "w1": jnp.transpose(w1, (2, 3, 1, 0)),   # (3,3,Cin,Cout)
        "b1": jax.random.uniform(ks[2], (1, cout), jnp.float32, -scale1, scale1),
        "g1": 1.0 + 0.1 * jax.random.normal(ks[3], (1, cout), jnp.float32),
        "be1": 0.1 * jax.random.normal(ks[4], (1, cout), jnp.float32),
        "w2": jnp.transpose(w2, (2, 3, 1, 0)),   # (3,3,Cout,Cout)
        "b2": jax.random.uniform(ks[5], (1, cout), jnp.float32, -scale2, scale2),
        "g2": 1.0 + 0.1 * jax.random.normal(ks[6], (1, cout), jnp.float32),
        "be2": 0.1 * jax.random.normal(ks[7], (1, cout), jnp.float32),
    }


if __name__ == "__main__":
    key = jax.random.PRNGKey(0)
    k_x, k_p, k_x2 = jax.random.split(key, 3)

    # Identity shortcut requires in_channels == out_channels.
    N, C, H, W = 2, 4, 16, 16
    x = jax.random.normal(k_x, (N, C, H, W), jnp.float32)
    params = init_params(k_p, C, C)
    ref = resblock_reference(x, params)

    # Strict path: f32 compute, f32 inter-stage activations.
    out = jax.block_until_ready(
        resblock_forward(x, params, compute_dtype=jnp.float32,
                         store_dtype=jnp.float32))
    assert out.shape == (N, C, H, W), out.shape
    err = float(jnp.max(jnp.abs(out - ref)))
    assert err < 5e-4, err

    # Default path: f32 compute, bf16 inter-stage activations (HBM halved).
    out_def = jax.block_until_ready(resblock_forward(x, params))
    err_def = float(jnp.max(jnp.abs(out_def - ref)))
    assert err_def < 0.1, err_def

    # Fast path: bf16 MXU compute + bf16 activations (f32 accumulation/stats).
    out_bf16 = jax.block_until_ready(
        resblock_forward(x, params, compute_dtype=jnp.bfloat16,
                         store_dtype=jnp.bfloat16))
    err_bf16 = float(jnp.max(jnp.abs(out_bf16 - ref)))
    assert err_bf16 < 0.25, err_bf16

    # Larger batch exercises the batched grid (b_tile > 1, 2 grid steps).
    N2 = 8
    x2 = jax.random.normal(k_x2, (N2, C, H, W), jnp.float32)
    ref2 = resblock_reference(x2, params)
    out2 = jax.block_until_ready(
        resblock_forward(x2, params, compute_dtype=jnp.float32,
                         store_dtype=jnp.float32))
    err2 = float(jnp.max(jnp.abs(out2 - ref2)))
    assert err2 < 5e-4, err2

    print("KERNEL_OK")
</pallas_src>

<mosaic_0001>
module attributes {stable_mosaic.version = 11 : i64} {
  func.func @_conv_stats_kernel(%arg0: i32, %arg1: memref<1x16x128xf32, #tpu.memory_space<vmem>>, %arg2: memref<3x128x128xf32, #tpu.memory_space<vmem>>, %arg3: memref<1x16x128xf32, #tpu.memory_space<vmem>>, %arg4: memref<1x1x128xf32, #tpu.memory_space<vmem>>, %arg5: memref<1x1x128xf32, #tpu.memory_space<vmem>>, %arg6: memref<18x128xf32, #tpu.memory_space<vmem>>) attributes {dimension_semantics = [#tpu.dimension_semantics<parallel>], iteration_bounds = array<i64: 2>, scalar_prefetch = 0 : i64, scratch_operands = 1 : i64, tpu.core_type = #tpu.core_type<tc>, window_params = [{transform_indices = @transform_0, window_bounds = array<i64: 1, 16, 128>}, {pipeline_mode = #tpu.pipeline_mode<synchronous>, transform_indices = @transform_1, window_bounds = array<i64: 3, 128, 128>}, {transform_indices = @transform_2, window_bounds = array<i64: 1, 16, 128>}, {transform_indices = @transform_3, window_bounds = array<i64: 1, 1, 128>}, {transform_indices = @transform_4, window_bounds = array<i64: 1, 1, 128>}]} {
    %cst = arith.constant 0.000000e+00 : f32
    %0 = vector.broadcast %cst : f32 to vector<1x128xf32>
    %c0 = arith.constant 0 : index
    %c0_0 = arith.constant 0 : index
    %c0_1 = arith.constant 0 : index
    %1 = vector.load %arg1[%c0, %c0_0, %c0_1] : memref<1x16x128xf32, #tpu.memory_space<vmem>>, vector<1x16x128xf32>
    %2 = vector.shape_cast %1 : vector<1x16x128xf32> to vector<16x128xf32>
    %c0_2 = arith.constant 0 : index
    %c0_3 = arith.constant 0 : index
    %3 = vector.load %arg6[%c0_2, %c0_3] : memref<18x128xf32, #tpu.memory_space<vmem>>, vector<1x128xf32>
    tpu.vector_store %arg6[%c0_2, %c0_3], %0 {strides = array<i32>} : memref<18x128xf32, #tpu.memory_space<vmem>>, vector<1x128xf32>,
    %c1 = arith.constant 1 : index
    %c0_4 = arith.constant 0 : index
    %4 = vector.load %arg6[%c1, %c0_4] : memref<18x128xf32, #tpu.memory_space<vmem>>, vector<16x128xf32>
    tpu.vector_store %arg6[%c1, %c0_4], %2 {strides = array<i32>} : memref<18x128xf32, #tpu.memory_space<vmem>>, vector<16x128xf32>,
    %c17 = arith.constant 17 : index
    %c0_5 = arith.constant 0 : index
    %5 = vector.load %arg6[%c17, %c0_5] : memref<18x128xf32, #tpu.memory_space<vmem>>, vector<1x128xf32>
    tpu.vector_store %arg6[%c17, %c0_5], %0 {strides = array<i32>} : memref<18x128xf32, #tpu.memory_space<vmem>>, vector<1x128xf32>,
    %cst_6 = arith.constant 0.000000e+00 : f32
    %6 = vector.broadcast %cst_6 : f32 to vector<16x128xf32>
    %c0_7 = arith.constant 0 : index
    %c0_8 = arith.constant 0 : index
    %7 = vector.load %arg6[%c0_7, %c0_8] : memref<18x128xf32, #tpu.memory_space<vmem>>, vector<16x128xf32>
    %c0_9 = arith.constant 0 : index
    %c0_10 = arith.constant 0 : index
    %c0_11 = arith.constant 0 : index
    %8 = vector.load %arg2[%c0_9, %c0_10, %c0_11] : memref<3x128x128xf32, #tpu.memory_space<vmem>>, vector<1x128x128xf32>
    %9 = vector.shape_cast %8 : vector<1x128x128xf32> to vector<128x128xf32>
    %cst_12 = arith.constant dense<0.000000e+00> : vector<16x128xf32>
    %10 = tpu.matmul %7, %9, %cst_12 {dimension_numbers = #tpu.dot_dimension_numbers<[1], [0], [0], [1], [0, 0, 1, 1], [], []>} : vector<16x128xf32>, vector<128x128xf32>, vector<16x128xf32> -> vector<16x128xf32>
    %11 = arith.addf %6, %10 : vector<16x128xf32>
    %c1_13 = arith.constant 1 : index
    %c0_14 = arith.constant 0 : index
    %12 = vector.load %arg6[%c1_13, %c0_14] : memref<18x128xf32, #tpu.memory_space<vmem>>, vector<16x128xf32>
    %c1_15 = arith.constant 1 : index
    %c0_16 = arith.constant 0 : index
    %c0_17 = arith.constant 0 : index
    %13 = vector.load %arg2[%c1_15, %c0_16, %c0_17] : memref<3x128x128xf32, #tpu.memory_space<vmem>>, vector<1x128x128xf32>
    %14 = vector.shape_cast %13 : vector<1x128x128xf32> to vector<128x128xf32>
    %cst_18 = arith.constant dense<0.000000e+00> : vector<16x128xf32>
    %15 = tpu.matmul %12, %14, %cst_18 {dimension_numbers = #tpu.dot_dimension_numbers<[1], [0], [0], [1], [0, 0, 1, 1], [], []>} : vector<16x128xf32>, vector<128x128xf32>, vector<16x128xf32> -> vector<16x128xf32>
    %16 = arith.addf %11, %15 : vector<16x128xf32>
    %c2 = arith.constant 2 : index
    %c0_19 = arith.constant 0 : index
    %17 = vector.load %arg6[%c2, %c0_19] : memref<18x128xf32, #tpu.memory_space<vmem>>, vector<16x128xf32>
    %c2_20 = arith.constant 2 : index
    %c0_21 = arith.constant 0 : index
    %c0_22 = arith.constant 0 : index
    %18 = vector.load %arg2[%c2_20, %c0_21, %c0_22] : memref<3x128x128xf32, #tpu.memory_space<vmem>>, vector<1x128x128xf32>
    %19 = vector.shape_cast %18 : vector<1x128x128xf32> to vector<128x128xf32>
    %cst_23 = arith.constant dense<0.000000e+00> : vector<16x128xf32>
    %20 = tpu.matmul %17, %19, %cst_23 {dimension_numbers = #tpu.dot_dimension_numbers<[1], [0], [0], [1], [0, 0, 1, 1], [], []>} : vector<16x128xf32>, vector<128x128xf32>, vector<16x128xf32> -> vector<16x128xf32>
    %21 = arith.addf %16, %20 : vector<16x128xf32>
    %cst_24 = arith.constant 0.000000e+00 : f32
    %22 = vector.broadcast %cst_24 : f32 to vector<1x128xf32>
    %cst_25 = arith.constant 0.000000e+00 : f32
    %23 = vector.broadcast %cst_25 : f32 to vector<1x128xf32>
    %c0_26 = arith.constant 0 : index
    %c0_27 = arith.constant 0 : index
    %c0_28 = arith.constant 0 : index
    %24 = vector.load %arg3[%c0_26, %c0_27, %c0_28] : memref<1x16x128xf32, #tpu.memory_space<vmem>>, vector<1x16x128xf32>
    %25 = vector.shape_cast %24 : vector<1x16x128xf32> to vector<16x128xf32>
    %26 = vector.shape_cast %21 : vector<16x128xf32> to vector<1x16x128xf32>
    tpu.vector_store %arg3[%c0_26, %c0_27, %c0_28], %26 {strides = array<i32>} : memref<1x16x128xf32, #tpu.memory_space<vmem>>, vector<1x16x128xf32>,
    %cst_29 = arith.constant dense<0.000000e+00> : vector<128xf32>
    %27 = vector.multi_reduction <add>, %21, %cst_29 [0] : vector<16x128xf32> to vector<128xf32>
    %28 = vector.shape_cast %27 : vector<128xf32> to vector<1x128xf32>
    %29 = arith.addf %22, %28 : vector<1x128xf32>
    %30 = arith.mulf %21, %21 : vector<16x128xf32>
    %cst_30 = arith.constant dense<0.000000e+00> : vector<128xf32>
    %31 = vector.multi_reduction <add>, %30, %cst_30 [0] : vector<16x128xf32> to vector<128xf32>
    %32 = vector.shape_cast %31 : vector<128xf32> to vector<1x128xf32>
    %33 = arith.addf %23, %32 : vector<1x128xf32>
    %c0_31 = arith.constant 0 : index
    %c0_32 = arith.constant 0 : index
    %c0_33 = arith.constant 0 : index
    %34 = vector.load %arg4[%c0_31, %c0_32, %c0_33] : memref<1x1x128xf32, #tpu.memory_space<vmem>>, vector<1x1x128xf32>
    %35 = vector.shape_cast %34 : vector<1x1x128xf32> to vector<1x128xf32>
    %36 = vector.shape_cast %29 : vector<1x128xf32> to vector<1x1x128xf32>
    tpu.vector_store %arg4[%c0_31, %c0_32, %c0_33], %36 {strides = array<i32>} : memref<1x1x128xf32, #tpu.memory_space<vmem>>, vector<1x1x128xf32>,
    %c0_34 = arith.constant 0 : index
    %c0_35 = arith.constant 0 : index
    %c0_36 = arith.constant 0 : index
    %37 = vector.load %arg5[%c0_34, %c0_35, %c0_36] : memref<1x1x128xf32, #tpu.memory_space<vmem>>, vector<1x1x128xf32>
    %38 = vector.shape_cast %37 : vector<1x1x128xf32> to vector<1x128xf32>
    %39 = vector.shape_cast %33 : vector<1x128xf32> to vector<1x1x128xf32>
    tpu.vector_store %arg5[%c0_34, %c0_35, %c0_36], %39 {strides = array<i32>} : memref<1x1x128xf32, #tpu.memory_space<vmem>>, vector<1x1x128xf32>,
    return
  }
  func.func @transform_0(%arg0: i32) -> (i32, i32, i32) {
    %c0_i32 = arith.constant 0 : i32
    %c0_i32_0 = arith.constant 0 : i32
    %c0_i32_1 = arith.constant 0 : i32
    return %arg0, %c0_i32, %c0_i32_0 : i32, i32, i32
  }
  func.func @transform_1(%arg0: i32) -> (i32, i32, i32) {
    %c0_i32 = arith.constant 0 : i32
    %c0_i32_0 = arith.constant 0 : i32
    %c0_i32_1 = arith.constant 0 : i32
    %c0_i32_2 = arith.constant 0 : i32
    return %c0_i32, %c0_i32_0, %c0_i32_1 : i32, i32, i32
  }
  func.func @transform_2(%arg0: i32) -> (i32, i32, i32) {
    %c0_i32 = arith.constant 0 : i32
    %c0_i32_0 = arith.constant 0 : i32
    %c0_i32_1 = arith.constant 0 : i32
    return %arg0, %c0_i32, %c0_i32_0 : i32, i32, i32
  }
  func.func @transform_3(%arg0: i32) -> (i32, i32, i32) {
    %c0_i32 = arith.constant 0 : i32
    %c0_i32_0 = arith.constant 0 : i32
    %c0_i32_1 = arith.constant 0 : i32
    return %arg0, %c0_i32, %c0_i32_0 : i32, i32, i32
  }
  func.func @transform_4(%arg0: i32) -> (i32, i32, i32) {
    %c0_i32 = arith.constant 0 : i32
    %c0_i32_0 = arith.constant 0 : i32
    %c0_i32_1 = arith.constant 0 : i32
    return %arg0, %c0_i32, %c0_i32_0 : i32, i32, i32
  }
}

module attributes {stable_mosaic.version = 11 : i64} {
  func.func @_conv_stats_kernel(%arg0: i32, %arg1: memref<1x16x128xf32, #tpu.memory_space<vmem>>, %arg2: memref<3x128x128xf32, #tpu.memory_space<vmem>>, %arg3: memref<1x128xf32, #tpu.memory_space<vmem>>, %arg4: memref<1x128xf32, #tpu.memory_space<vmem>>, %arg5: memref<1x16x128xf32, #tpu.memory_space<vmem>>, %arg6: memref<1x1x128xf32, #tpu.memory_space<vmem>>, %arg7: memref<1x1x128xf32, #tpu.memory_space<vmem>>, %arg8: memref<18x128xf32, #tpu.memory_space<vmem>>) attributes {dimension_semantics = [#tpu.dimension_semantics<parallel>], iteration_bounds = array<i64: 2>, scalar_prefetch = 0 : i64, scratch_operands = 1 : i64, tpu.core_type = #tpu.core_type<tc>, window_params = [{transform_indices = @transform_0, window_bounds = array<i64: 1, 16, 128>}, {pipeline_mode = #tpu.pipeline_mode<synchronous>, transform_indices = @transform_1, window_bounds = array<i64: 3, 128, 128>}, {pipeline_mode = #tpu.pipeline_mode<synchronous>, transform_indices = @transform_2, window_bounds = array<i64: 1, 128>}, {pipeline_mode = #tpu.pipeline_mode<synchronous>, transform_indices = @transform_3, window_bounds = array<i64: 1, 128>}, {transform_indices = @transform_4, window_bounds = array<i64: 1, 16, 128>}, {transform_indices = @transform_5, window_bounds = array<i64: 1, 1, 128>}, {transform_indices = @transform_6, window_bounds = array<i64: 1, 1, 128>}]} {
    %c0 = arith.constant 0 : index
    %c0_0 = arith.constant 0 : index
    %0 = vector.load %arg3[%c0, %c0_0] : memref<1x128xf32, #tpu.memory_space<vmem>>, vector<1x128xf32>
    %c0_1 = arith.constant 0 : index
    %c0_2 = arith.constant 0 : index
    %1 = vector.load %arg4[%c0_1, %c0_2] : memref<1x128xf32, #tpu.memory_space<vmem>>, vector<1x128xf32>
    %cst = arith.constant 0.000000e+00 : f32
    %2 = vector.broadcast %cst : f32 to vector<1x128xf32>
    %c0_3 = arith.constant 0 : index
    %c0_4 = arith.constant 0 : index
    %c0_5 = arith.constant 0 : index
    %3 = vector.load %arg1[%c0_3, %c0_4, %c0_5] : memref<1x16x128xf32, #tpu.memory_space<vmem>>, vector<1x16x128xf32>
    %4 = vector.shape_cast %3 : vector<1x16x128xf32> to vector<16x128xf32>
    %5 = vector.broadcast %0 : vector<1x128xf32> to vector<16x128xf32>
    %6 = arith.mulf %4, %5 : vector<16x128xf32>
    %7 = vector.broadcast %1 : vector<1x128xf32> to vector<16x128xf32>
    %8 = arith.addf %6, %7 : vector<16x128xf32>
    %cst_6 = arith.constant 0.000000e+00 : f32
    %9 = vector.broadcast %cst_6 : f32 to vector<16x128xf32>
    %10 = arith.maximumf %8, %9 : vector<16x128xf32>
    %c0_7 = arith.constant 0 : index
    %c0_8 = arith.constant 0 : index
    %11 = vector.load %arg8[%c0_7, %c0_8] : memref<18x128xf32, #tpu.memory_space<vmem>>, vector<1x128xf32>
    tpu.vector_store %arg8[%c0_7, %c0_8], %2 {strides = array<i32>} : memref<18x128xf32, #tpu.memory_space<vmem>>, vector<1x128xf32>,
    %c1 = arith.constant 1 : index
    %c0_9 = arith.constant 0 : index
    %12 = vector.load %arg8[%c1, %c0_9] : memref<18x128xf32, #tpu.memory_space<vmem>>, vector<16x128xf32>
    tpu.vector_store %arg8[%c1, %c0_9], %10 {strides = array<i32>} : memref<18x128xf32, #tpu.memory_space<vmem>>, vector<16x128xf32>,
    %c17 = arith.constant 17 : index
    %c0_10 = arith.constant 0 : index
    %13 = vector.load %arg8[%c17, %c0_10] : memref<18x128xf32, #tpu.memory_space<vmem>>, vector<1x128xf32>
    tpu.vector_store %arg8[%c17, %c0_10], %2 {strides = array<i32>} : memref<18x128xf32, #tpu.memory_space<vmem>>, vector<1x128xf32>,
    %cst_11 = arith.constant 0.000000e+00 : f32
    %14 = vector.broadcast %cst_11 : f32 to vector<16x128xf32>
    %c0_12 = arith.constant 0 : index
    %c0_13 = arith.constant 0 : index
    %15 = vector.load %arg8[%c0_12, %c0_13] : memref<18x128xf32, #tpu.memory_space<vmem>>, vector<16x128xf32>
    %c0_14 = arith.constant 0 : index
    %c0_15 = arith.constant 0 : index
    %c0_16 = arith.constant 0 : index
    %16 = vector.load %arg2[%c0_14, %c0_15, %c0_16] : memref<3x128x128xf32, #tpu.memory_space<vmem>>, vector<1x128x128xf32>
    %17 = vector.shape_cast %16 : vector<1x128x128xf32> to vector<128x128xf32>
    %cst_17 = arith.constant dense<0.000000e+00> : vector<16x128xf32>
    %18 = tpu.matmul %15, %17, %cst_17 {dimension_numbers = #tpu.dot_dimension_numbers<[1], [0], [0], [1], [0, 0, 1, 1], [], []>} : vector<16x128xf32>, vector<128x128xf32>, vector<16x128xf32> -> vector<16x128xf32>
    %19 = arith.addf %14, %18 : vector<16x128xf32>
    %c1_18 = arith.constant 1 : index
    %c0_19 = arith.constant 0 : index
    %20 = vector.load %arg8[%c1_18, %c0_19] : memref<18x128xf32, #tpu.memory_space<vmem>>, vector<16x128xf32>
    %c1_20 = arith.constant 1 : index
    %c0_21 = arith.constant 0 : index
    %c0_22 = arith.constant 0 : index
    %21 = vector.load %arg2[%c1_20, %c0_21, %c0_22] : memref<3x128x128xf32, #tpu.memory_space<vmem>>, vector<1x128x128xf32>
    %22 = vector.shape_cast %21 : vector<1x128x128xf32> to vector<128x128xf32>
    %cst_23 = arith.constant dense<0.000000e+00> : vector<16x128xf32>
    %23 = tpu.matmul %20, %22, %cst_23 {dimension_numbers = #tpu.dot_dimension_numbers<[1], [0], [0], [1], [0, 0, 1, 1], [], []>} : vector<16x128xf32>, vector<128x128xf32>, vector<16x128xf32> -> vector<16x128xf32>
    %24 = arith.addf %19, %23 : vector<16x128xf32>
    %c2 = arith.constant 2 : index
    %c0_24 = arith.constant 0 : index
    %25 = vector.load %arg8[%c2, %c0_24] : memref<18x128xf32, #tpu.memory_space<vmem>>, vector<16x128xf32>
    %c2_25 = arith.constant 2 : index
    %c0_26 = arith.constant 0 : index
    %c0_27 = arith.constant 0 : index
    %26 = vector.load %arg2[%c2_25, %c0_26, %c0_27] : memref<3x128x128xf32, #tpu.memory_space<vmem>>, vector<1x128x128xf32>
    %27 = vector.shape_cast %26 : vector<1x128x128xf32> to vector<128x128xf32>
    %cst_28 = arith.constant dense<0.000000e+00> : vector<16x128xf32>
    %28 = tpu.matmul %25, %27, %cst_28 {dimension_numbers = #tpu.dot_dimension_numbers<[1], [0], [0], [1], [0, 0, 1, 1], [], []>} : vector<16x128xf32>, vector<128x128xf32>, vector<16x128xf32> -> vector<16x128xf32>
    %29 = arith.addf %24, %28 : vector<16x128xf32>
    %cst_29 = arith.constant 0.000000e+00 : f32
    %30 = vector.broadcast %cst_29 : f32 to vector<1x128xf32>
    %cst_30 = arith.constant 0.000000e+00 : f32
    %31 = vector.broadcast %cst_30 : f32 to vector<1x128xf32>
    %c0_31 = arith.constant 0 : index
    %c0_32 = arith.constant 0 : index
    %c0_33 = arith.constant 0 : index
    %32 = vector.load %arg5[%c0_31, %c0_32, %c0_33] : memref<1x16x128xf32, #tpu.memory_space<vmem>>, vector<1x16x128xf32>
    %33 = vector.shape_cast %32 : vector<1x16x128xf32> to vector<16x128xf32>
    %34 = vector.shape_cast %29 : vector<16x128xf32> to vector<1x16x128xf32>
    tpu.vector_store %arg5[%c0_31, %c0_32, %c0_33], %34 {strides = array<i32>} : memref<1x16x128xf32, #tpu.memory_space<vmem>>, vector<1x16x128xf32>,
    %cst_34 = arith.constant dense<0.000000e+00> : vector<128xf32>
    %35 = vector.multi_reduction <add>, %29, %cst_34 [0] : vector<16x128xf32> to vector<128xf32>
    %36 = vector.shape_cast %35 : vector<128xf32> to vector<1x128xf32>
    %37 = arith.addf %30, %36 : vector<1x128xf32>
    %38 = arith.mulf %29, %29 : vector<16x128xf32>
    %cst_35 = arith.constant dense<0.000000e+00> : vector<128xf32>
    %39 = vector.multi_reduction <add>, %38, %cst_35 [0] : vector<16x128xf32> to vector<128xf32>
    %40 = vector.shape_cast %39 : vector<128xf32> to vector<1x128xf32>
    %41 = arith.addf %31, %40 : vector<1x128xf32>
    %c0_36 = arith.constant 0 : index
    %c0_37 = arith.constant 0 : index
    %c0_38 = arith.constant 0 : index
    %42 = vector.load %arg6[%c0_36, %c0_37, %c0_38] : memref<1x1x128xf32, #tpu.memory_space<vmem>>, vector<1x1x128xf32>
    %43 = vector.shape_cast %42 : vector<1x1x128xf32> to vector<1x128xf32>
    %44 = vector.shape_cast %37 : vector<1x128xf32> to vector<1x1x128xf32>
    tpu.vector_store %arg6[%c0_36, %c0_37, %c0_38], %44 {strides = array<i32>} : memref<1x1x128xf32, #tpu.memory_space<vmem>>, vector<1x1x128xf32>,
    %c0_39 = arith.constant 0 : index
    %c0_40 = arith.constant 0 : index
    %c0_41 = arith.constant 0 : index
    %45 = vector.load %arg7[%c0_39, %c0_40, %c0_41] : memref<1x1x128xf32, #tpu.memory_space<vmem>>, vector<1x1x128xf32>
    %46 = vector.shape_cast %45 : vector<1x1x128xf32> to vector<1x128xf32>
    %47 = vector.shape_cast %41 : vector<1x128xf32> to vector<1x1x128xf32>
    tpu.vector_store %arg7[%c0_39, %c0_40, %c0_41], %47 {strides = array<i32>} : memref<1x1x128xf32, #tpu.memory_space<vmem>>, vector<1x1x128xf32>,
    return
  }
  func.func @transform_0(%arg0: i32) -> (i32, i32, i32) {
    %c0_i32 = arith.constant 0 : i32
    %c0_i32_0 = arith.constant 0 : i32
    %c0_i32_1 = arith.constant 0 : i32
    return %arg0, %c0_i32, %c0_i32_0 : i32, i32, i32
  }
  func.func @transform_1(%arg0: i32) -> (i32, i32, i32) {
    %c0_i32 = arith.constant 0 : i32
    %c0_i32_0 = arith.constant 0 : i32
    %c0_i32_1 = arith.constant 0 : i32
    %c0_i32_2 = arith.constant 0 : i32
    return %c0_i32, %c0_i32_0, %c0_i32_1 : i32, i32, i32
  }
  func.func @transform_2(%arg0: i32) -> (i32, i32) {
    %c0_i32 = arith.constant 0 : i32
    %c0_i32_0 = arith.constant 0 : i32
    %c0_i32_1 = arith.constant 0 : i32
    return %c0_i32, %c0_i32_0 : i32, i32
  }
  func.func @transform_3(%arg0: i32) -> (i32, i32) {
    %c0_i32 = arith.constant 0 : i32
    %c0_i32_0 = arith.constant 0 : i32
    %c0_i32_1 = arith.constant 0 : i32
    return %c0_i32, %c0_i32_0 : i32, i32
  }
  func.func @transform_4(%arg0: i32) -> (i32, i32, i32) {
    %c0_i32 = arith.constant 0 : i32
    %c0_i32_0 = arith.constant 0 : i32
    %c0_i32_1 = arith.constant 0 : i32
    return %arg0, %c0_i32, %c0_i32_0 : i32, i32, i32
  }
  func.func @transform_5(%arg0: i32) -> (i32, i32, i32) {
    %c0_i32 = arith.constant 0 : i32
    %c0_i32_0 = arith.constant 0 : i32
    %c0_i32_1 = arith.constant 0 : i32
    return %arg0, %c0_i32, %c0_i32_0 : i32, i32, i32
  }
  func.func @transform_6(%arg0: i32) -> (i32, i32, i32) {
    %c0_i32 = arith.constant 0 : i32
    %c0_i32_0 = arith.constant 0 : i32
    %c0_i32_1 = arith.constant 0 : i32
    return %arg0, %c0_i32, %c0_i32_0 : i32, i32, i32
  }
}

module attributes {stable_mosaic.version = 11 : i64} {
  func.func @_finalize_kernel(%arg0: i32, %arg1: memref<1x16x128xf32, #tpu.memory_space<vmem>>, %arg2: memref<1x128xf32, #tpu.memory_space<vmem>>, %arg3: memref<1x128xf32, #tpu.memory_space<vmem>>, %arg4: memref<1x16x128xf32, #tpu.memory_space<vmem>>, %arg5: memref<1x16x128xf32, #tpu.memory_space<vmem>>) attributes {dimension_semantics = [#tpu.dimension_semantics<parallel>], iteration_bounds = array<i64: 2>, scalar_prefetch = 0 : i64, scratch_operands = 0 : i64, tpu.core_type = #tpu.core_type<tc>, window_params = [{transform_indices = @transform_0, window_bounds = array<i64: 1, 16, 128>}, {pipeline_mode = #tpu.pipeline_mode<synchronous>, transform_indices = @transform_1, window_bounds = array<i64: 1, 128>}, {pipeline_mode = #tpu.pipeline_mode<synchronous>, transform_indices = @transform_2, window_bounds = array<i64: 1, 128>}, {transform_indices = @transform_3, window_bounds = array<i64: 1, 16, 128>}, {transform_indices = @transform_4, window_bounds = array<i64: 1, 16, 128>}]} {
    %c0 = arith.constant 0 : index
    %c0_0 = arith.constant 0 : index
    %c0_1 = arith.constant 0 : index
    %0 = vector.load %arg1[%c0, %c0_0, %c0_1] : memref<1x16x128xf32, #tpu.memory_space<vmem>>, vector<1x16x128xf32>
    %c0_2 = arith.constant 0 : index
    %c0_3 = arith.constant 0 : index
    %1 = vector.load %arg2[%c0_2, %c0_3] : memref<1x128xf32, #tpu.memory_space<vmem>>, vector<1x128xf32>
    %2 = vector.shape_cast %1 : vector<1x128xf32> to vector<1x1x128xf32>
    %3 = vector.broadcast %2 : vector<1x1x128xf32> to vector<1x16x128xf32>
    %4 = arith.mulf %0, %3 : vector<1x16x128xf32>
    %c0_4 = arith.constant 0 : index
    %c0_5 = arith.constant 0 : index
    %5 = vector.load %arg3[%c0_4, %c0_5] : memref<1x128xf32, #tpu.memory_space<vmem>>, vector<1x128xf32>
    %6 = vector.shape_cast %5 : vector<1x128xf32> to vector<1x1x128xf32>
    %7 = vector.broadcast %6 : vector<1x1x128xf32> to vector<1x16x128xf32>
    %8 = arith.addf %4, %7 : vector<1x16x128xf32>
    %cst = arith.constant 0.000000e+00 : f32
    %9 = vector.broadcast %cst : f32 to vector<1x16x128xf32>
    %10 = arith.maximumf %8, %9 : vector<1x16x128xf32>
    %c0_6 = arith.constant 0 : index
    %c0_7 = arith.constant 0 : index
    %c0_8 = arith.constant 0 : index
    %11 = vector.load %arg4[%c0_6, %c0_7, %c0_8] : memref<1x16x128xf32, #tpu.memory_space<vmem>>, vector<1x16x128xf32>
    %12 = arith.addf %10, %11 : vector<1x16x128xf32>
    %cst_9 = arith.constant 0.000000e+00 : f32
    %13 = vector.broadcast %cst_9 : f32 to vector<1x16x128xf32>
    %14 = arith.maximumf %12, %13 : vector<1x16x128xf32>
    %c0_10 = arith.constant 0 : index
    %c0_11 = arith.constant 0 : index
    %c0_12 = arith.constant 0 : index
    %15 = vector.load %arg5[%c0_10, %c0_11, %c0_12] : memref<1x16x128xf32, #tpu.memory_space<vmem>>, vector<1x16x128xf32>
    tpu.vector_store %arg5[%c0_10, %c0_11, %c0_12], %14 {strides = array<i32>} : memref<1x16x128xf32, #tpu.memory_space<vmem>>, vector<1x16x128xf32>,
    return
  }
  func.func @transform_0(%arg0: i32) -> (i32, i32, i32) {
    %c0_i32 = arith.constant 0 : i32
    %c0_i32_0 = arith.constant 0 : i32
    %c0_i32_1 = arith.constant 0 : i32
    return %arg0, %c0_i32, %c0_i32_0 : i32, i32, i32
  }
  func.func @transform_1(%arg0: i32) -> (i32, i32) {
    %c0_i32 = arith.constant 0 : i32
    %c0_i32_0 = arith.constant 0 : i32
    %c0_i32_1 = arith.constant 0 : i32
    return %c0_i32, %c0_i32_0 : i32, i32
  }
  func.func @transform_2(%arg0: i32) -> (i32, i32) {
    %c0_i32 = arith.constant 0 : i32
    %c0_i32_0 = arith.constant 0 : i32
    %c0_i32_1 = arith.constant 0 : i32
    return %c0_i32, %c0_i32_0 : i32, i32
  }
  func.func @transform_3(%arg0: i32) -> (i32, i32, i32) {
    %c0_i32 = arith.constant 0 : i32
    %c0_i32_0 = arith.constant 0 : i32
    %c0_i32_1 = arith.constant 0 : i32
    return %arg0, %c0_i32, %c0_i32_0 : i32, i32, i32
  }
  func.func @transform_4(%arg0: i32) -> (i32, i32, i32) {
    %c0_i32 = arith.constant 0 : i32
    %c0_i32_0 = arith.constant 0 : i32
    %c0_i32_1 = arith.constant 0 : i32
    return %arg0, %c0_i32, %c0_i32_0 : i32, i32, i32
  }
}

</mosaic_0001>

<bundles_post_ra>
// kernel: tile.23
= control target key start
LH: loop header
LB: loop body
LE: loop exit
PB: predicated region body
PF: predicated region fallthrough
CT: control target
= control target key end

     0   :  { %s28_s0 = inlined_call_operand.vmem [shape: f32[8], index: 0, kind: input, shape index: {}]   ;;  %s29_s1 = inlined_call_operand.vmem [shape: f32[16,8], index: 1, kind: output, shape index: {}]  }
   0x1   :  { %v4_v0 = vld [vmem:[%s28_s0] ss:$0 sm:$0xff] }
   0x2   :  { %5 = vst [vmem:[%s29_s1] sm:$0xff] %v4_v0  ;;  %8 = vst [vmem:[%s29_s1 + $0x8] sm:$0xff] %v4_v0 }

// kernel: tile.24
= control target key start
LH: loop header
LB: loop body
LE: loop exit
PB: predicated region body
PF: predicated region fallthrough
CT: control target
= control target key end

     0   :  { %s133_s10 = smov 120   ;;  %s134_s11 = smov 104   ;;  %vm3_vm0 = vcmask 64512   ;;  %vm9_vm1 = vcmask 1048512   ;;  %vm15_vm2 = vcmask 982912   ;;  %vm21_vm3 = vcmask 917312   ;;  %s209_s0 = inlined_call_operand.vmem [shape: f32[16,8], index: 0, kind: input, shape index: {}]   ;;  %s210_s1 = inlined_call_operand.vmem [shape: f32[1,128], index: 1, kind: output, shape index: {}]  }
   0x1   :  { %v103_v0 = vld [vmem:[%s209_s0 + $0xf] sm:$0x1]   ;;  %v105_v1 = vld [vmem:[%s209_s0 + $0xd] sm:$0x1]   ;;  %v104_v2 = vld [vmem:[%s209_s0 + $0xe] sm:$0x1]  }
   0x2   :  { %7 = vrot.lane.b32.xlu0 %v103_v0, %s133_s10  ;;  %19 = vrot.lane.b32.xlu1 %v105_v1, %s134_s11  ;;  %v106_v3 = vld [vmem:[%s209_s0 + $0xc] sm:$0x1]   ;;  %s135_s16 = smov 112   ;;  %s136_s17 = smov 96   ;;  %v107_v4 = vld [vmem:[%s209_s0 + $0xb] sm:$0x1]  }
   0x3   :  { %v108_v5 = vld [vmem:[%s209_s0 + $0xa] sm:$0x1]   ;;  %v2_v6 = vld [vmem:[%s209_s0] sm:$0x1]   ;;  %s137_s24 = smov 88   ;;  %s138_s25 = smov 80  }
   0x4   :  { %4 = vst.msk [vmem:[#allocation0] sm:$0x1] %vm3_vm0, %v2_v6   ;;  %v109_v7 = vld [vmem:[%s209_s0 + $0x9] sm:$0x1]   ;;  %v110_v8 = vld [vmem:[%s209_s0 + $0x8] sm:$0x1]  }
   0x5   :  { %s139_s30 = smov 72   ;;  %s140_s2 = smov 64   ;;  %v111_v9 = vld [vmem:[%s209_s0 + $0x7] sm:$0x1]   ;;  %v112_v10 = vld [vmem:[%s209_s0 + $0x6] sm:$0x1]  }
   0x6   :  { %13 = vrot.lane.b32.xlu0 %v104_v2, %s135_s16  ;;  %25 = vrot.lane.b32.xlu1 %v106_v3, %s136_s17  ;;  %s141_s7 = smov 56   ;;  %s142_s8 = smov 48   ;;  %v113_v11 = vld [vmem:[%s209_s0 + $0x5] sm:$0x1]   ;;  %v114_v12 = vld [vmem:[%s209_s0 + $0x4] sm:$0x1]  }
   0x7   :  { %s143_s13 = smov 40   ;;  %s144_s14 = smov 32   ;;  %v115_v13 = vld [vmem:[%s209_s0 + $0x3] sm:$0x1]   ;;  %v116_v14 = vld [vmem:[%s209_s0 + $0x2] sm:$0x1]  }
   0x8   :  { %s145_s19 = smov 24   ;;  %s146_s20 = smov 16   ;;  %v117_v15 = vld [vmem:[%s209_s0 + $0x1] sm:$0x1]   ;;  %vm27_vm4 = vcmask 851712   ;;  %vm33_vm5 = vcmask 786112  }
   0x9   :  { %s147_s0 = smov 8   ;;  %vm39_vm6 = vcmask 720512   ;;  %vm45_vm7 = vcmask 654912   ;;  %vm51_vm8 = vcmask 589312   ;;  %vm57_vm9 = vcmask 523712  }
   0xa   :  { %31 = vrot.lane.b32.xlu0 %v107_v4, %s137_s24  ;;  %37 = vrot.lane.b32.xlu1 %v108_v5, %s138_s25  ;;  %vm63_vm10 = vcmask 458112   ;;  %vm69_vm11 = vcmask 392512   ;;  %vm75_vm12 = vcmask 326912   ;;  %vm81_vm13 = vcmask 261312  }
   0xb   :  { %vm87_vm14 = vcmask 195712   ;;  %vm93_vm15 = vcmask 130112  }
   0xe   :  { %43 = vrot.lane.b32.xlu0 %v109_v7, %s139_s30  ;;  %49 = vrot.lane.b32.xlu1 %v110_v8, %s140_s2 }
  0x12   :  { %55 = vrot.lane.b32.xlu0 %v111_v9, %s141_s7  ;;  %61 = vrot.lane.b32.xlu1 %v112_v10, %s142_s8 }
  0x16   :  { %67 = vrot.lane.b32.xlu0 %v113_v11, %s143_s13  ;;  %73 = vrot.lane.b32.xlu1 %v114_v12, %s144_s14 }
  0x1a   :  { %79 = vrot.lane.b32.xlu0 %v115_v13, %s145_s19  ;;  %85 = vrot.lane.b32.xlu1 %v116_v14, %s146_s20 }
  0x1e   :  { %91 = vrot.lane.b32.xlu0 %v117_v15, %s147_s0 }
  0x74   :  { %v8_v16 = vpop.permute.xlu0 %7   ;;  %v20_v17 = vpop.permute.xlu1 %19  }
  0x75   :  { %10 = vst.msk [vmem:[#allocation0] sm:$0x1] %vm9_vm1, %v8_v16  }
  0x78   :  { %v14_v18 = vpop.permute.xlu0 %13   ;;  %v26_v19 = vpop.permute.xlu1 %25  }
  0x79   :  { %16 = vst.msk [vmem:[#allocation0] sm:$0x1] %vm15_vm2, %v14_v18  }
  0x7a   :  { %22 = vst.msk [vmem:[#allocation0] sm:$0x1] %vm21_vm3, %v20_v17  }
  0x7b   :  { %28 = vst.msk [vmem:[#allocation0] sm:$0x1] %vm27_vm4, %v26_v19  }
  0x7c   :  { %v32_v20 = vpop.permute.xlu0 %31   ;;  %v38_v21 = vpop.permute.xlu1 %37  }
  0x7d   :  { %34 = vst.msk [vmem:[#allocation0] sm:$0x1] %vm33_vm5, %v32_v20  }
  0x7e   :  { %40 = vst.msk [vmem:[#allocation0] sm:$0x1] %vm39_vm6, %v38_v21  }
  0x80   :  { %v44_v22 = vpop.permute.xlu0 %43   ;;  %v50_v23 = vpop.permute.xlu1 %49  }
  0x81   :  { %46 = vst.msk [vmem:[#allocation0] sm:$0x1] %vm45_vm7, %v44_v22  }
  0x82   :  { %52 = vst.msk [vmem:[#allocation0] sm:$0x1] %vm51_vm8, %v50_v23  }
  0x84   :  { %v56_v24 = vpop.permute.xlu0 %55   ;;  %v62_v25 = vpop.permute.xlu1 %61  }
  0x85   :  { %58 = vst.msk [vmem:[#allocation0] sm:$0x1] %vm57_vm9, %v56_v24  }
  0x86   :  { %64 = vst.msk [vmem:[#allocation0] sm:$0x1] %vm63_vm10, %v62_v25  }
  0x88   :  { %v68_v26 = vpop.permute.xlu0 %67   ;;  %v74_v27 = vpop.permute.xlu1 %73  }
  0x89   :  { %70 = vst.msk [vmem:[#allocation0] sm:$0x1] %vm69_vm11, %v68_v26  }
  0x8a   :  { %76 = vst.msk [vmem:[#allocation0] sm:$0x1] %vm75_vm12, %v74_v27  }
  0x8c   :  { %v80_v28 = vpop.permute.xlu0 %79   ;;  %v86_v29 = vpop.permute.xlu1 %85  }
  0x8d   :  { %82 = vst.msk [vmem:[#allocation0] sm:$0x1] %vm81_vm13, %v80_v28  }
  0x8e   :  { %88 = vst.msk [vmem:[#allocation0] sm:$0x1] %vm87_vm14, %v86_v29  }
  0x90   :  { %v92_v30 = vpop.permute.xlu0 %91  }
  0x91   :  { %94 = vst.msk [vmem:[#allocation0] sm:$0x1] %vm93_vm15, %v92_v30  }
  0x98   :  { %v99_v31 = vld [vmem:[#allocation0] sm:$0x1] }
  0x99   :  { %102 = vst [vmem:[%s210_s1] sm:$0x1] %v99_v31 }

// kernel: resblock_forward.3
= control target key start
LH: loop header
LB: loop body
LE: loop exit
PB: predicated region body
PF: predicated region fallthrough
CT: control target
= control target key end

     0   :  { %s878_s15 = smov 0   ;;  %s1062_s0 = inlined_call_operand.vmem [shape: f32[2,16,128], index: 0, kind: input, shape index: {}]   ;;  %s1063_s1 = inlined_call_operand.vmem [shape: f32[3,128,128], index: 1, kind: input, shape index: {}]   ;;  %s1064_s2 = inlined_call_operand.vmem [shape: f32[2,16,128], index: 2, kind: output, shape index: {0}]   ;;  %s1065_s3 = inlined_call_operand.vmem [shape: f32[2,1,128], index: 3, kind: output, shape index: {1}]   ;;  %s1066_s4 = inlined_call_operand.vmem [shape: f32[2,1,128], index: 4, kind: output, shape index: {2}]  }
   0x1 LB: > { %s631_s16 = sadd.s32 4294967295, %s850_s15   ;;  %p635_p0 = scmp.ge.s32.totalorder %s850_s15, 1  ;;  %s850_s15 = sphi %s878_s15, %s15_s15  }
   0x2   : > { %p167_p1 = scmp.lt.s32.totalorder %s850_s15, 3 }
   0x4   : > { %p168_p2 = pnand %p635_p0, %p167_p1 }
   0x5   : > { %p199_p3 = scmp.lt.s32.totalorder (!%p168_p2), %s631_s16, 1 }
   0x6   : > { %171 = sbr.rel (%p168_p2) target bundleno = 292 (0x124), region = 28 }
   0xb   : > { %v655_v0 = vld [vmem:[%s1063_s1 + $0xf8] sm:$0xff]  ;;  %v654_v2 = vld [vmem:[%s1063_s1 + $0xf0] sm:$0xff]  ;;  %v852_v4 = vmov 0.0   ;;  %v653_v5 = vld [vmem:[%s1063_s1 + $0xe8] sm:$0xff]  ;;  %s1068_s16 = smov (!%p199_p3, %s631_s16), 1 }
   0xc   : > { %v238_v1 = vld [vmem:[%s1063_s1 + $0x78] sm:$0xff]  ;;  %730 = vmatprep.subr.mxu0 %v655_v0  ;;  %v237_v3 = vld [vmem:[%s1063_s1 + $0x70] sm:$0xff]  ;;  %217 = vst [vmem:[#allocation2] sm:$0x1] %v852_v4  ;;  %220 = vst [vmem:[#allocation2 + $0x11] sm:$0x1] %v852_v4  ;;  %s211_s28 = scalar_lea.vmem %s1065_s3, %s1068_s16  ;;  %s214_s5 = scalar_lea.vmem %s1066_s4, %s1068_s16 }
   0xd   : > { %765 = vmatprep.subr.mxu1 %v238_v1  ;;  %731 = vmatpush3.msra.mxu0 %v655_v0  ;;  %v236_v6 = vld [vmem:[%s1063_s1 + $0x68] sm:$0xff]  ;;  %v652_v7 = vld [vmem:[%s1063_s1 + $0xe0] sm:$0xff]  ;;  %s674_s7 = sshll.u32 %s1068_s16, 4  ;;  %v651_v9 = vld [vmem:[%s1063_s1 + $0xd8] sm:$0xff] }
   0xe   : > { %766 = vmatpush3.msra.mxu1 %v238_v1  ;;  %732 = vmatprep.subr.mxu0 %v654_v2  ;;  %v235_v8 = vld [vmem:[%s1063_s1 + $0x60] sm:$0xff]  ;;  %v234_v10 = vld [vmem:[%s1063_s1 + $0x58] sm:$0xff]  ;;  %s203_s14 = scalar_lea.vmem %s1062_s0, %s674_s7  ;;  %v650_v11 = vld [vmem:[%s1063_s1 + $0xd0] sm:$0xff]  ;;  %s208_s26 = scalar_lea.vmem %s1064_s2, %s674_s7 }
   0xf   : > { %767 = vmatprep.subr.mxu1 %v237_v3  ;;  %733 = vmatpush3.msra.mxu0 %v654_v2  ;;  %v233_v12 = vld [vmem:[%s1063_s1 + $0x50] sm:$0xff]  ;;  %v649_v13 = vld [vmem:[%s1063_s1 + $0xc8] sm:$0xff]  ;;  %v936_v15 = vld [vmem:[%s203_s14] sm:$0xff] }
  0x10   : > { %768 = vmatpush3.msra.mxu1 %v237_v3  ;;  %734 = vmatprep.subr.mxu0 %v653_v5  ;;  %v232_v14 = vld [vmem:[%s1063_s1 + $0x48] sm:$0xff]  ;;  %218 = vst [vmem:[#allocation2 + $0x1] sm:$0xff] %v936_v15  ;;  %v648_v17 = vld [vmem:[%s1063_s1 + $0xc0] sm:$0xff]  ;;  %v647_v19 = vld [vmem:[%s1063_s1 + $0xb8] sm:$0xff] }
  0x11   : > { %769 = vmatprep.subr.mxu1 %v236_v6  ;;  %735 = vmatpush3.msra.mxu0 %v653_v5  ;;  %v939_v16 = vld [vmem:[%s203_s14 + $0x8] sm:$0xff]  ;;  %v231_v18 = vld [vmem:[%s1063_s1 + $0x40] sm:$0xff]  ;;  %v230_v20 = vld [vmem:[%s1063_s1 + $0x38] sm:$0xff] }
  0x12   : > { %770 = vmatpush3.msra.mxu1 %v236_v6  ;;  %736 = vmatprep.subr.mxu0 %v652_v7  ;;  %219 = vst [vmem:[#allocation2 + $0x9] sm:$0xff] %v939_v16  ;;  %v646_v21 = vld [vmem:[%s1063_s1 + $0xb0] sm:$0xff]  ;;  %v645_v23 = vld [vmem:[%s1063_s1 + $0xa8] sm:$0xff]  ;;  %v644_v25 = vld [vmem:[%s1063_s1 + $0xa0] sm:$0xff] }
  0x13   : > { %771 = vmatprep.subr.mxu1 %v235_v8  ;;  %737 = vmatpush3.msra.mxu0 %v652_v7  ;;  %v229_v22 = vld [vmem:[%s1063_s1 + $0x30] sm:$0xff]  ;;  %v228_v24 = vld [vmem:[%s1063_s1 + $0x28] sm:$0xff]  ;;  %v227_v26 = vld [vmem:[%s1063_s1 + $0x20] sm:$0xff] }
  0x14   : > { %772 = vmatpush3.msra.mxu1 %v235_v8  ;;  %738 = vmatprep.subr.mxu0 %v651_v9  ;;  %v643_v27 = vld [vmem:[%s1063_s1 + $0x98] sm:$0xff]  ;;  %v642_v29 = vld [vmem:[%s1063_s1 + $0x90] sm:$0xff]  ;;  %v641_v31 = vld [vmem:[%s1063_s1 + $0x88] sm:$0xff] }
  0x15   : > { %773 = vmatprep.subr.mxu1 %v234_v10  ;;  %739 = vmatpush3.msra.mxu0 %v651_v9  ;;  %v226_v28 = vld [vmem:[%s1063_s1 + $0x18] sm:$0xff]  ;;  %v225_v30 = vld [vmem:[%s1063_s1 + $0x10] sm:$0xff]  ;;  %v224_v32 = vld [vmem:[%s1063_s1 + $0x8] sm:$0xff] }
  0x16   : > { %774 = vmatpush3.msra.mxu1 %v234_v10  ;;  %740 = vmatprep.subr.mxu0 %v650_v11  ;;  %v640_v33 = vld [vmem:[%s1063_s1 + $0x80] sm:$0xff]  ;;  %v671_v37 = vld [vmem:[%s1063_s1 + $0x178] sm:$0xff]  ;;  %v670_v39 = vld [vmem:[%s1063_s1 + $0x170] sm:$0xff] }
  0x17   : > { %775 = vmatprep.subr.mxu1 %v233_v12  ;;  %741 = vmatpush3.msra.mxu0 %v650_v11  ;;  %v223_v34 = vld [vmem:[%s1063_s1] sm:$0xff]  ;;  %v669_v40 = vld [vmem:[%s1063_s1 + $0x168] sm:$0xff]  ;;  %v667_v42 = vld [vmem:[%s1063_s1 + $0x158] sm:$0xff] }
  0x18   : > { %776 = vmatpush3.msra.mxu1 %v233_v12  ;;  %742 = vmatprep.subr.mxu0 %v649_v13  ;;  %v221_v35 = vld [vmem:[#allocation2] sm:$0xff]  ;;  %v666_v43 = vld [vmem:[%s1063_s1 + $0x150] sm:$0xff]  ;;  %v665_v44 = vld [vmem:[%s1063_s1 + $0x148] sm:$0xff] }
  0x19   : > { %777 = vmatprep.subr.mxu1 %v232_v14  ;;  %743 = vmatpush3.msra.mxu0 %v649_v13  ;;  %v222_v36 = vld [vmem:[#allocation2 + $0x8] sm:$0xff]  ;;  %v668_v41 = vld [vmem:[%s1063_s1 + $0x160] sm:$0xff]  ;;  %v663_v46 = vld [vmem:[%s1063_s1 + $0x138] sm:$0xff] }
  0x1a   : > { %778 = vmatpush3.msra.mxu1 %v232_v14  ;;  %744 = vmatprep.subr.mxu0 %v648_v17  ;;  %v408_v38 = vld [vmem:[#allocation2 + $0x2] sm:$0xff]  ;;  %v662_v47 = vld [vmem:[%s1063_s1 + $0x130] sm:$0xff]  ;;  %v659_v50 = vld [vmem:[%s1063_s1 + $0x118] sm:$0xff] }
  0x1b   : > { %779 = vmatprep.subr.mxu1 %v231_v18  ;;  %745 = vmatpush3.msra.mxu0 %v648_v17  ;;  %v664_v45 = vld [vmem:[%s1063_s1 + $0x140] sm:$0xff]  ;;  %v661_v48 = vld [vmem:[%s1063_s1 + $0x128] sm:$0xff]  ;;  %v658_v51 = vld [vmem:[%s1063_s1 + $0x110] sm:$0xff] }
  0x1c   : > { %780 = vmatpush3.msra.mxu1 %v231_v18  ;;  %746 = vmatprep.subr.mxu0 %v647_v19  ;;  %v660_v49 = vld [vmem:[%s1063_s1 + $0x120] sm:$0xff]  ;;  %v657_v52 = vld [vmem:[%s1063_s1 + $0x108] sm:$0xff] }
  0x1d   : > { %781 = vmatprep.subr.mxu1 %v230_v20  ;;  %747 = vmatpush3.msra.mxu0 %v647_v19  ;;  %v656_v53 = vld [vmem:[%s1063_s1 + $0x100] sm:$0xff]  ;;  %v409_v54 = vld [vmem:[#allocation2 + $0xa] sm:$0xff] }
  0x1e   : > { %782 = vmatpush3.msra.mxu1 %v230_v20  ;;  %748 = vmatprep.subr.mxu0 %v646_v21 }
  0x1f   : > { %783 = vmatprep.subr.mxu1 %v229_v22  ;;  %749 = vmatpush3.msra.mxu0 %v646_v21 }
  0x20   : > { %784 = vmatpush3.msra.mxu1 %v229_v22  ;;  %750 = vmatprep.subr.mxu0 %v645_v23 }
  0x21   : > { %785 = vmatprep.subr.mxu1 %v228_v24  ;;  %751 = vmatpush3.msra.mxu0 %v645_v23 }
  0x22   : > { %786 = vmatpush3.msra.mxu1 %v228_v24  ;;  %752 = vmatprep.subr.mxu0 %v644_v25 }
  0x23   : > { %787 = vmatprep.subr.mxu1 %v227_v26  ;;  %753 = vmatpush3.msra.mxu0 %v644_v25 }
  0x24   : > { %788 = vmatpush3.msra.mxu1 %v227_v26  ;;  %754 = vmatprep.subr.mxu0 %v643_v27 }
  0x25   : > { %789 = vmatprep.subr.mxu1 %v226_v28  ;;  %755 = vmatpush3.msra.mxu0 %v643_v27 }
  0x26   : > { %790 = vmatpush3.msra.mxu1 %v226_v28  ;;  %756 = vmatprep.subr.mxu0 %v642_v29 }
  0x27   : > { %791 = vmatprep.subr.mxu1 %v225_v30  ;;  %757 = vmatpush3.msra.mxu0 %v642_v29 }
  0x28   : > { %792 = vmatpush3.msra.mxu1 %v225_v30  ;;  %758 = vmatprep.subr.mxu0 %v641_v31 }
  0x29   : > { %793 = vmatprep.subr.mxu1 %v224_v32  ;;  %759 = vmatpush3.msra.mxu0 %v641_v31 }
  0x2a   : > { %794 = vmatpush3.msra.mxu1 %v224_v32  ;;  %760 = vmatprep.subr.mxu0 %v640_v33 }
  0x2b   : > { %795 = vmatprep.subr.mxu1 %v223_v34  ;;  %761 = vmatpush3.msra.mxu0 %v640_v33 }
  0x2c   : > { %762 = vmatprep.mubr.f32.mxu0 %v936_v15  ;;  %796 = vmatpush3.msra.mxu1 %v223_v34 }
  0x2d   : > { %797 = vmatprep.mubr.f32.mxu1 %v221_v35  ;;  %763 = vmatmul.mubr.f32.vlgmr.msra.gmra.mxu0 %v939_v16 }
  0x2e   : > { %798 = vmatmul.mubr.f32.vlgmr.msra.gmra.mxu1 %v222_v36  ;;  %800 = vmatprep.subr.mxu0 %v671_v37 }
  0x2f   : > { %832 = vmatprep.mubr.f32.mxu0 %v408_v38  ;;  %801 = vmatpush3.msra.mxu0 %v671_v37 }
  0x30   : > { %802 = vmatprep.subr.mxu0 %v670_v39 }
  0x31   : > { %803 = vmatpush3.msra.mxu0 %v670_v39 }
  0x32   : > { %804 = vmatprep.subr.mxu0 %v669_v40 }
  0x33   : > { %805 = vmatpush3.msra.mxu0 %v669_v40 }
  0x34   : > { %806 = vmatprep.subr.mxu0 %v668_v41 }
  0x35   : > { %807 = vmatpush3.msra.mxu0 %v668_v41 }
  0x36   : > { %808 = vmatprep.subr.mxu0 %v667_v42 }
  0x37   : > { %809 = vmatpush3.msra.mxu0 %v667_v42 }
  0x38   : > { %810 = vmatprep.subr.mxu0 %v666_v43 }
  0x39   : > { %811 = vmatpush3.msra.mxu0 %v666_v43 }
  0x3a   : > { %812 = vmatprep.subr.mxu0 %v665_v44 }
  0x3b   : > { %813 = vmatpush3.msra.mxu0 %v665_v44 }
  0x3c   : > { %814 = vmatprep.subr.mxu0 %v664_v45 }
  0x3d   : > { %815 = vmatpush3.msra.mxu0 %v664_v45 }
  0x3e   : > { %816 = vmatprep.subr.mxu0 %v663_v46 }
  0x3f   : > { %817 = vmatpush3.msra.mxu0 %v663_v46 }
  0x40   : > { %818 = vmatprep.subr.mxu0 %v662_v47 }
  0x41   : > { %819 = vmatpush3.msra.mxu0 %v662_v47 }
  0x42   : > { %820 = vmatprep.subr.mxu0 %v661_v48 }
  0x43   : > { %821 = vmatpush3.msra.mxu0 %v661_v48 }
  0x44   : > { %822 = vmatprep.subr.mxu0 %v660_v49 }
  0x45   : > { %823 = vmatpush3.msra.mxu0 %v660_v49 }
  0x46   : > { %824 = vmatprep.subr.mxu0 %v659_v50 }
  0x47   : > { %825 = vmatpush3.msra.mxu0 %v659_v50 }
  0x48   : > { %826 = vmatprep.subr.mxu0 %v658_v51 }
  0x49   : > { %827 = vmatpush3.msra.mxu0 %v658_v51 }
  0x4a   : > { %828 = vmatprep.subr.mxu0 %v657_v52 }
  0x4b   : > { %829 = vmatpush3.msra.mxu0 %v657_v52 }
  0x4c   : > { %830 = vmatprep.subr.mxu0 %v656_v53 }
  0x4d   : > { %831 = vmatpush3.msra.mxu0 %v656_v53 }
  0x4e   : > { %833 = vmatmul.mubr.f32.vlgmr.msra.gmra.mxu0 %v409_v54 }
  0xed   : > { %v764_v55 = vpop.f32.mrf.mxu0 }
  0xee   : > { %v799_v56 = vpop.f32.mrf.mxu1 }
  0xef   : > { %v324_v57 = vpop.f32.mrf.mxu0  ;;  %v405_v59 = vadd.f32 %v799_v56, %v764_v55 }
  0xf0   : > { %v399_v58 = vpop.f32.mrf.mxu1 }
  0xf1   : > { %v400_v61 = vadd.f32 %v399_v58, %v324_v57 }
 0x10e   : > { %v834_v60 = vpop.f32.mrf.mxu0 }
 0x10f   : > { %v503_v62 = vadd.f32 %v834_v60, %v405_v59 }
 0x110   : > { %v493_v63 = vpop.f32.mrf.mxu0 }
 0x111   : > { %505 = vst [vmem:[%s208_s26 + $0x8] sm:$0xff] %v503_v62  ;;  %v502_v0 = vadd.f32 %v493_v63, %v400_v61  ;;  %v515_v1 = vmul.f32 %v503_v62, %v503_v62 }
 0x113   : > { %504 = vst [vmem:[%s208_s26] sm:$0xff] %v502_v0  ;;  %v506_v2 = vadd.f32 %v503_v62, %v502_v0  ;;  %v514_v3 = vmul.f32 %v502_v0, %v502_v0 }
 0x115   : > { %v507_v4 = vrot.slane %v506_v2, 4  ;;  %v516_v5 = vadd.f32 %v515_v1, %v514_v3 }
 0x117   : > { %v508_v6 = vadd.f32 %v507_v4, %v506_v2  ;;  %v517_v7 = vrot.slane %v516_v5, 4 }
 0x119   : > { %v509_v8 = vrot.slane %v508_v6, 2  ;;  %v518_v9 = vadd.f32 %v517_v7, %v516_v5 }
 0x11b   : > { %v510_v10 = vadd.f32 %v509_v8, %v508_v6  ;;  %v519_v11 = vrot.slane %v518_v9, 2 }
 0x11d   : > { %v511_v12 = vrot.slane %v510_v10, 1  ;;  %v520_v13 = vadd.f32 %v519_v11, %v518_v9 }
 0x11f   : > { %v512_v14 = vadd.f32 %v511_v12, %v510_v10  ;;  %v521_v15 = vrot.slane %v520_v13, 1 }
 0x121   : > { %v522_v16 = vadd.f32 %v521_v15, %v520_v13  ;;  %524 = vst [vmem:[%s211_s28] sm:$0x1] %v512_v14 }
 0x123   : > { %525 = vst [vmem:[%s214_s5] sm:$0x1] %v522_v16 }
 0x124 PF: > { %s15_s15 = sadd.s32 1, %s850_s15  }
 0x125   : > { %p12_p4 = scmp.ge.s32.totalorder %s15_s15, 4  }
 0x127   :  { %14 = sbr.rel (!%p12_p4) target bundleno = 1 (0x1), region = 84 }

// kernel: resblock_forward.4
= control target key start
LH: loop header
LB: loop body
LE: loop exit
PB: predicated region body
PF: predicated region fallthrough
CT: control target
= control target key end

     0   :  { %s964_s21 = smov 0   ;;  %s1146_s0 = inlined_call_operand.vmem [shape: f32[2,16,128], index: 0, kind: input, shape index: {}]   ;;  %s1147_s1 = inlined_call_operand.vmem [shape: f32[3,128,128], index: 1, kind: input, shape index: {}]   ;;  %s1148_s2 = inlined_call_operand.vmem [shape: f32[1,128], index: 2, kind: input, shape index: {}]   ;;  %s1149_s3 = inlined_call_operand.vmem [shape: f32[1,128], index: 3, kind: input, shape index: {}]   ;;  %s1150_s4 = inlined_call_operand.vmem [shape: f32[2,16,128], index: 4, kind: output, shape index: {0}]   ;;  %s1151_s5 = inlined_call_operand.vmem [shape: f32[2,1,128], index: 5, kind: output, shape index: {1}]   ;;  %s1152_s6 = inlined_call_operand.vmem [shape: f32[2,1,128], index: 6, kind: output, shape index: {2}]  }
   0x1 LB: > { %s705_s22 = sadd.s32 4294967295, %s926_s21   ;;  %p709_p0 = scmp.ge.s32.totalorder %s926_s21, 1  ;;  %s926_s21 = sphi %s964_s21, %s17_s21  }
   0x2   : > { %p217_p1 = scmp.lt.s32.totalorder %s926_s21, 3 }
   0x4   : > { %p218_p2 = pnand %p709_p0, %p217_p1 }
   0x5   : > { %p253_p3 = scmp.lt.s32.totalorder (!%p218_p2), %s705_s22, 1 }
   0x6   : > { %221 = sbr.rel (%p218_p2) target bundleno = 292 (0x124), region = 36 }
   0xb   : > { %v731_v0 = vld [vmem:[%s1147_s1 + $0xf8] sm:$0xff]  ;;  %v730_v2 = vld [vmem:[%s1147_s1 + $0xf0] sm:$0xff]  ;;  %v928_v4 = vmov 0.0   ;;  %v729_v5 = vld [vmem:[%s1147_s1 + $0xe8] sm:$0xff]  ;;  %s1154_s22 = smov (!%p253_p3, %s705_s22), 1 }
   0xc   : > { %v312_v1 = vld [vmem:[%s1147_s1 + $0x78] sm:$0xff]  ;;  %806 = vmatprep.subr.mxu0 %v731_v0  ;;  %v311_v3 = vld [vmem:[%s1147_s1 + $0x70] sm:$0xff]  ;;  %291 = vst [vmem:[#allocation2] sm:$0x1] %v928_v4  ;;  %294 = vst [vmem:[#allocation2 + $0x11] sm:$0x1] %v928_v4  ;;  %s265_s25 = scalar_lea.vmem %s1151_s5, %s1154_s22 }
   0xd   : > { %841 = vmatprep.subr.mxu1 %v312_v1  ;;  %807 = vmatpush3.msra.mxu0 %v731_v0  ;;  %v310_v6 = vld [vmem:[%s1147_s1 + $0x68] sm:$0xff]  ;;  %v728_v7 = vld [vmem:[%s1147_s1 + $0xe0] sm:$0xff]  ;;  %s750_s15 = sshll.u32 %s1154_s22, 4  ;;  %v727_v9 = vld [vmem:[%s1147_s1 + $0xd8] sm:$0xff] }
   0xe   : > { %842 = vmatpush3.msra.mxu1 %v312_v1  ;;  %808 = vmatprep.subr.mxu0 %v730_v2  ;;  %v309_v8 = vld [vmem:[%s1147_s1 + $0x60] sm:$0xff]  ;;  %v308_v10 = vld [vmem:[%s1147_s1 + $0x58] sm:$0xff]  ;;  %v726_v11 = vld [vmem:[%s1147_s1 + $0xd0] sm:$0xff]  ;;  %s257_s28 = scalar_lea.vmem %s1146_s0, %s750_s15  ;;  %s262_s23 = scalar_lea.vmem %s1150_s4, %s750_s15 }
   0xf   : > { %843 = vmatprep.subr.mxu1 %v311_v3  ;;  %809 = vmatpush3.msra.mxu0 %v730_v2  ;;  %v307_v12 = vld [vmem:[%s1147_s1 + $0x50] sm:$0xff]  ;;  %v725_v13 = vld [vmem:[%s1147_s1 + $0xc8] sm:$0xff]  ;;  %v714_v15 = vld [vmem:[%s1148_s2] ss:$0 sm:$0xff] }
  0x10   : > { %844 = vmatpush3.msra.mxu1 %v311_v3  ;;  %810 = vmatprep.subr.mxu0 %v729_v5  ;;  %v306_v14 = vld [vmem:[%s1147_s1 + $0x48] sm:$0xff]  ;;  %v715_v16 = vld [vmem:[%s1149_s3] ss:$0 sm:$0xff]  ;;  %v723_v23 = vld [vmem:[%s1147_s1 + $0xb8] sm:$0xff] }
  0x11   : > { %845 = vmatprep.subr.mxu1 %v310_v6  ;;  %811 = vmatpush3.msra.mxu0 %v729_v5  ;;  %v271_v17 = vld [vmem:[%s257_s28] sm:$0xff]  ;;  %v272_v18 = vld [vmem:[%s257_s28 + $0x8] sm:$0xff]  ;;  %v304_v24 = vld [vmem:[%s1147_s1 + $0x38] sm:$0xff]  ;;  %s268_s28 = scalar_lea.vmem %s1152_s6, %s1154_s22 }
  0x12   : > { %846 = vmatpush3.msra.mxu1 %v310_v6  ;;  %812 = vmatprep.subr.mxu0 %v728_v7  ;;  %v724_v19 = vld [vmem:[%s1147_s1 + $0xc0] sm:$0xff]  ;;  %v279_v21 = vmul.f32 %v714_v15, %v271_v17  ;;  %v280_v22 = vmul.f32 %v714_v15, %v272_v18  ;;  %v722_v27 = vld [vmem:[%s1147_s1 + $0xb0] sm:$0xff]  ;;  %v721_v31 = vld [vmem:[%s1147_s1 + $0xa8] sm:$0xff] }
  0x13   : > { %847 = vmatprep.subr.mxu1 %v309_v8  ;;  %813 = vmatpush3.msra.mxu0 %v728_v7  ;;  %v305_v20 = vld [vmem:[%s1147_s1 + $0x40] sm:$0xff]  ;;  %v303_v28 = vld [vmem:[%s1147_s1 + $0x30] sm:$0xff]  ;;  %v302_v32 = vld [vmem:[%s1147_s1 + $0x28] sm:$0xff] }
  0x14   : > { %848 = vmatpush3.msra.mxu1 %v309_v8  ;;  %814 = vmatprep.subr.mxu0 %v727_v9  ;;  %v287_v25 = vadd.f32 %v715_v16, %v279_v21  ;;  %v288_v26 = vadd.f32 %v715_v16, %v280_v22  ;;  %v720_v33 = vld [vmem:[%s1147_s1 + $0xa0] sm:$0xff]  ;;  %v719_v35 = vld [vmem:[%s1147_s1 + $0x98] sm:$0xff]  ;;  %v718_v37 = vld [vmem:[%s1147_s1 + $0x90] sm:$0xff] }
  0x15   : > { %849 = vmatprep.subr.mxu1 %v308_v10  ;;  %815 = vmatpush3.msra.mxu0 %v727_v9  ;;  %v301_v34 = vld [vmem:[%s1147_s1 + $0x20] sm:$0xff]  ;;  %v300_v36 = vld [vmem:[%s1147_s1 + $0x18] sm:$0xff]  ;;  %v299_v38 = vld [vmem:[%s1147_s1 + $0x10] sm:$0xff] }
  0x16   : > { %850 = vmatpush3.msra.mxu1 %v308_v10  ;;  %816 = vmatprep.subr.mxu0 %v726_v11  ;;  %v289_v29 = vmax.f32 %v287_v25, 0.0  ;;  %v290_v30 = vmax.f32 %v288_v26, 0.0  ;;  %v717_v39 = vld [vmem:[%s1147_s1 + $0x88] sm:$0xff]  ;;  %v716_v41 = vld [vmem:[%s1147_s1 + $0x80] sm:$0xff]  ;;  %v747_v45 = vld [vmem:[%s1147_s1 + $0x178] sm:$0xff] }
  0x17   : > { %851 = vmatprep.subr.mxu1 %v307_v12  ;;  %817 = vmatpush3.msra.mxu0 %v726_v11  ;;  %v298_v40 = vld [vmem:[%s1147_s1 + $0x8] sm:$0xff]  ;;  %v297_v42 = vld [vmem:[%s1147_s1] sm:$0xff]  ;;  %v746_v47 = vld [vmem:[%s1147_s1 + $0x170] sm:$0xff] }
  0x18   : > { %852 = vmatpush3.msra.mxu1 %v307_v12  ;;  %818 = vmatprep.subr.mxu0 %v725_v13  ;;  %292 = vst [vmem:[#allocation2 + $0x1] sm:$0xff] %v289_v29  ;;  %293 = vst [vmem:[#allocation2 + $0x9] sm:$0xff] %v290_v30  ;;  %v745_v48 = vld [vmem:[%s1147_s1 + $0x168] sm:$0xff]  ;;  %v744_v49 = vld [vmem:[%s1147_s1 + $0x160] sm:$0xff] }
  0x19   : > { %853 = vmatprep.subr.mxu1 %v306_v14  ;;  %819 = vmatpush3.msra.mxu0 %v725_v13  ;;  %v743_v50 = vld [vmem:[%s1147_s1 + $0x158] sm:$0xff]  ;;  %v742_v51 = vld [vmem:[%s1147_s1 + $0x150] sm:$0xff]  ;;  %v741_v52 = vld [vmem:[%s1147_s1 + $0x148] sm:$0xff] }
  0x1a   : > { %854 = vmatpush3.msra.mxu1 %v306_v14  ;;  %820 = vmatprep.subr.mxu0 %v724_v19  ;;  %v740_v53 = vld [vmem:[%s1147_s1 + $0x140] sm:$0xff]  ;;  %v739_v54 = vld [vmem:[%s1147_s1 + $0x138] sm:$0xff]  ;;  %v738_v55 = vld [vmem:[%s1147_s1 + $0x130] sm:$0xff] }
  0x1b   : > { %855 = vmatprep.subr.mxu1 %v305_v20  ;;  %821 = vmatpush3.msra.mxu0 %v724_v19  ;;  %v737_v56 = vld [vmem:[%s1147_s1 + $0x128] sm:$0xff]  ;;  %v736_v57 = vld [vmem:[%s1147_s1 + $0x120] sm:$0xff]  ;;  %v735_v58 = vld [vmem:[%s1147_s1 + $0x118] sm:$0xff] }
  0x1c   : > { %856 = vmatpush3.msra.mxu1 %v305_v20  ;;  %822 = vmatprep.subr.mxu0 %v723_v23  ;;  %v734_v59 = vld [vmem:[%s1147_s1 + $0x110] sm:$0xff]  ;;  %v733_v60 = vld [vmem:[%s1147_s1 + $0x108] sm:$0xff]  ;;  %v732_v61 = vld [vmem:[%s1147_s1 + $0x100] sm:$0xff] }
  0x1d   : > { %857 = vmatprep.subr.mxu1 %v304_v24  ;;  %823 = vmatpush3.msra.mxu0 %v723_v23 }
  0x1e   : > { %858 = vmatpush3.msra.mxu1 %v304_v24  ;;  %824 = vmatprep.subr.mxu0 %v722_v27 }
  0x1f   : > { %859 = vmatprep.subr.mxu1 %v303_v28  ;;  %825 = vmatpush3.msra.mxu0 %v722_v27  ;;  %v295_v43 = vld [vmem:[#allocation2] sm:$0xff]  ;;  %v296_v44 = vld [vmem:[#allocation2 + $0x8] sm:$0xff] }
  0x20   : > { %860 = vmatpush3.msra.mxu1 %v303_v28  ;;  %826 = vmatprep.subr.mxu0 %v721_v31  ;;  %v482_v46 = vld [vmem:[#allocation2 + $0x2] sm:$0xff]  ;;  %v483_v62 = vld [vmem:[#allocation2 + $0xa] sm:$0xff] }
  0x21   : > { %861 = vmatprep.subr.mxu1 %v302_v32  ;;  %827 = vmatpush3.msra.mxu0 %v721_v31 }
  0x22   : > { %862 = vmatpush3.msra.mxu1 %v302_v32  ;;  %828 = vmatprep.subr.mxu0 %v720_v33 }
  0x23   : > { %863 = vmatprep.subr.mxu1 %v301_v34  ;;  %829 = vmatpush3.msra.mxu0 %v720_v33 }
  0x24   : > { %864 = vmatpush3.msra.mxu1 %v301_v34  ;;  %830 = vmatprep.subr.mxu0 %v719_v35 }
  0x25   : > { %865 = vmatprep.subr.mxu1 %v300_v36  ;;  %831 = vmatpush3.msra.mxu0 %v719_v35 }
  0x26   : > { %866 = vmatpush3.msra.mxu1 %v300_v36  ;;  %832 = vmatprep.subr.mxu0 %v718_v37 }
  0x27   : > { %867 = vmatprep.subr.mxu1 %v299_v38  ;;  %833 = vmatpush3.msra.mxu0 %v718_v37 }
  0x28   : > { %868 = vmatpush3.msra.mxu1 %v299_v38  ;;  %834 = vmatprep.subr.mxu0 %v717_v39 }
  0x29   : > { %869 = vmatprep.subr.mxu1 %v298_v40  ;;  %835 = vmatpush3.msra.mxu0 %v717_v39 }
  0x2a   : > { %870 = vmatpush3.msra.mxu1 %v298_v40  ;;  %836 = vmatprep.subr.mxu0 %v716_v41 }
  0x2b   : > { %871 = vmatprep.subr.mxu1 %v297_v42  ;;  %837 = vmatpush3.msra.mxu0 %v716_v41 }
  0x2c   : > { %838 = vmatprep.mubr.f32.mxu0 %v289_v29  ;;  %872 = vmatpush3.msra.mxu1 %v297_v42 }
  0x2d   : > { %873 = vmatprep.mubr.f32.mxu1 %v295_v43  ;;  %839 = vmatmul.mubr.f32.vlgmr.msra.gmra.mxu0 %v290_v30 }
  0x2e   : > { %874 = vmatmul.mubr.f32.vlgmr.msra.gmra.mxu1 %v296_v44  ;;  %876 = vmatprep.subr.mxu0 %v747_v45 }
  0x2f   : > { %908 = vmatprep.mubr.f32.mxu0 %v482_v46  ;;  %877 = vmatpush3.msra.mxu0 %v747_v45 }
  0x30   : > { %878 = vmatprep.subr.mxu0 %v746_v47 }
  0x31   : > { %879 = vmatpush3.msra.mxu0 %v746_v47 }
  0x32   : > { %880 = vmatprep.subr.mxu0 %v745_v48 }
  0x33   : > { %881 = vmatpush3.msra.mxu0 %v745_v48 }
  0x34   : > { %882 = vmatprep.subr.mxu0 %v744_v49 }
  0x35   : > { %883 = vmatpush3.msra.mxu0 %v744_v49 }
  0x36   : > { %884 = vmatprep.subr.mxu0 %v743_v50 }
  0x37   : > { %885 = vmatpush3.msra.mxu0 %v743_v50 }
  0x38   : > { %886 = vmatprep.subr.mxu0 %v742_v51 }
  0x39   : > { %887 = vmatpush3.msra.mxu0 %v742_v51 }
  0x3a   : > { %888 = vmatprep.subr.mxu0 %v741_v52 }
  0x3b   : > { %889 = vmatpush3.msra.mxu0 %v741_v52 }
  0x3c   : > { %890 = vmatprep.subr.mxu0 %v740_v53 }
  0x3d   : > { %891 = vmatpush3.msra.mxu0 %v740_v53 }
  0x3e   : > { %892 = vmatprep.subr.mxu0 %v739_v54 }
  0x3f   : > { %893 = vmatpush3.msra.mxu0 %v739_v54 }
  0x40   : > { %894 = vmatprep.subr.mxu0 %v738_v55 }
  0x41   : > { %895 = vmatpush3.msra.mxu0 %v738_v55 }
  0x42   : > { %896 = vmatprep.subr.mxu0 %v737_v56 }
  0x43   : > { %897 = vmatpush3.msra.mxu0 %v737_v56 }
  0x44   : > { %898 = vmatprep.subr.mxu0 %v736_v57 }
  0x45   : > { %899 = vmatpush3.msra.mxu0 %v736_v57 }
  0x46   : > { %900 = vmatprep.subr.mxu0 %v735_v58 }
  0x47   : > { %901 = vmatpush3.msra.mxu0 %v735_v58 }
  0x48   : > { %902 = vmatprep.subr.mxu0 %v734_v59 }
  0x49   : > { %903 = vmatpush3.msra.mxu0 %v734_v59 }
  0x4a   : > { %904 = vmatprep.subr.mxu0 %v733_v60 }
  0x4b   : > { %905 = vmatpush3.msra.mxu0 %v733_v60 }
  0x4c   : > { %906 = vmatprep.subr.mxu0 %v732_v61 }
  0x4d   : > { %907 = vmatpush3.msra.mxu0 %v732_v61 }
  0x4e   : > { %909 = vmatmul.mubr.f32.vlgmr.msra.gmra.mxu0 %v483_v62 }
  0xed   : > { %v840_v63 = vpop.f32.mrf.mxu0 }
  0xee   : > { %v875_v0 = vpop.f32.mrf.mxu1 }
  0xef   : > { %v398_v1 = vpop.f32.mrf.mxu0  ;;  %v479_v3 = vadd.f32 %v875_v0, %v840_v63 }
  0xf0   : > { %v473_v2 = vpop.f32.mrf.mxu1 }
  0xf1   : > { %v474_v5 = vadd.f32 %v473_v2, %v398_v1 }
 0x10e   : > { %v910_v4 = vpop.f32.mrf.mxu0 }
 0x10f   : > { %v577_v6 = vadd.f32 %v910_v4, %v479_v3 }
 0x110   : > { %v567_v7 = vpop.f32.mrf.mxu0 }
 0x111   : > { %579 = vst [vmem:[%s262_s23 + $0x8] sm:$0xff] %v577_v6  ;;  %v576_v8 = vadd.f32 %v567_v7, %v474_v5  ;;  %v589_v9 = vmul.f32 %v577_v6, %v577_v6 }
 0x113   : > { %578 = vst [vmem:[%s262_s23] sm:$0xff] %v576_v8  ;;  %v580_v10 = vadd.f32 %v577_v6, %v576_v8  ;;  %v588_v11 = vmul.f32 %v576_v8, %v576_v8 }
 0x115   : > { %v581_v12 = vrot.slane %v580_v10, 4  ;;  %v590_v13 = vadd.f32 %v589_v9, %v588_v11 }
 0x117   : > { %v582_v14 = vadd.f32 %v581_v12, %v580_v10  ;;  %v591_v15 = vrot.slane %v590_v13, 4 }
 0x119   : > { %v583_v16 = vrot.slane %v582_v14, 2  ;;  %v592_v17 = vadd.f32 %v591_v15, %v590_v13 }
 0x11b   : > { %v584_v18 = vadd.f32 %v583_v16, %v582_v14  ;;  %v593_v19 = vrot.slane %v592_v17, 2 }
 0x11d   : > { %v585_v20 = vrot.slane %v584_v18, 1  ;;  %v594_v21 = vadd.f32 %v593_v19, %v592_v17 }
 0x11f   : > { %v586_v22 = vadd.f32 %v585_v20, %v584_v18  ;;  %v595_v23 = vrot.slane %v594_v21, 1 }
 0x121   : > { %v596_v24 = vadd.f32 %v595_v23, %v594_v21  ;;  %598 = vst [vmem:[%s265_s25] sm:$0x1] %v586_v22 }
 0x123   : > { %599 = vst [vmem:[%s268_s28] sm:$0x1] %v596_v24 }
 0x124 PF: > { %s17_s21 = sadd.s32 1, %s926_s21  }
 0x125   : > { %p14_p4 = scmp.ge.s32.totalorder %s17_s21, 4  }
 0x127   :  { %16 = sbr.rel (!%p14_p4) target bundleno = 1 (0x1), region = 92 }

// kernel: resblock_forward.5
= control target key start
LH: loop header
LB: loop body
LE: loop exit
PB: predicated region body
PF: predicated region fallthrough
CT: control target
= control target key end

     0   :  { %s374_s15 = smov 0   ;;  %s400_s0 = inlined_call_operand.vmem [shape: f32[2,16,128], index: 0, kind: input, shape index: {}]   ;;  %s401_s1 = inlined_call_operand.vmem [shape: f32[1,128], index: 1, kind: input, shape index: {}]   ;;  %s402_s2 = inlined_call_operand.vmem [shape: f32[1,128], index: 2, kind: input, shape index: {}]   ;;  %s403_s3 = inlined_call_operand.vmem [shape: f32[2,16,128], index: 3, kind: input, shape index: {}]   ;;  %s404_s4 = inlined_call_operand.vmem [shape: f32[2,16,128], index: 4, kind: output, shape index: {}]  }
   0x1 LB: > { %s315_s16 = sadd.s32 4294967295, %s347_s15   ;;  %p319_p0 = scmp.ge.s32.totalorder %s347_s15, 1  ;;  %s347_s15 = sphi %s374_s15, %s14_s15  }
   0x2   : > { %p172_p1 = scmp.lt.s32.totalorder %s347_s15, 3 }
   0x4   : > { %p173_p2 = pnand %p319_p0, %p172_p1 }
   0x5   : > { %p203_p3 = scmp.lt.s32.totalorder (!%p173_p2), %s315_s16, 1 }
   0x6   : > { %176 = sbr.rel (%p173_p2) target bundleno = 26 (0x1a), region = 36 }
   0xb   : > { %s406_s16 = smov (!%p203_p3, %s315_s16), 1  ;;  %v326_v0 = vld [vmem:[%s401_s1] ss:$0 sm:$0xff] }
   0xc   : > { %s330_s17 = sshll.u32 %s406_s16, 4  ;;  %v327_v3 = vld [vmem:[%s402_s2] ss:$0 sm:$0xff] }
   0xd   : > { %s207_s22 = scalar_lea.vmem %s400_s0, %s330_s17  ;;  %s212_s27 = scalar_lea.vmem %s403_s3, %s330_s17 }
   0xe   : > { %v218_v1 = vld [vmem:[%s207_s22] sm:$0xff]  ;;  %v219_v2 = vld [vmem:[%s207_s22 + $0x8] sm:$0xff]  ;;  %s217_s30 = scalar_lea.vmem %s404_s4, %s330_s17 }
   0xf   : > { %v227_v4 = vmul.f32 %v326_v0, %v218_v1  ;;  %v228_v5 = vmul.f32 %v326_v0, %v219_v2  ;;  %v240_v8 = vld [vmem:[%s212_s27] sm:$0xff]  ;;  %v241_v9 = vld [vmem:[%s212_s27 + $0x8] sm:$0xff] }
  0x11   : > { %v236_v6 = vadd.f32 %v327_v3, %v227_v4  ;;  %v237_v7 = vadd.f32 %v327_v3, %v228_v5 }
  0x13   : > { %v238_v10 = vmax.f32 %v236_v6, 0.0  ;;  %v239_v11 = vmax.f32 %v237_v7, 0.0 }
  0x15   : > { %v242_v12 = vadd.f32 %v240_v8, %v238_v10  ;;  %v243_v13 = vadd.f32 %v241_v9, %v239_v11 }
  0x17   : > { %v244_v14 = vmax.f32 %v242_v12, 0.0  ;;  %v245_v15 = vmax.f32 %v243_v13, 0.0 }
  0x19   : > { %246 = vst [vmem:[%s217_s30] sm:$0xff] %v244_v14  ;;  %247 = vst [vmem:[%s217_s30 + $0x8] sm:$0xff] %v245_v15 }
  0x1a PF: > { %s14_s15 = sadd.s32 1, %s347_s15  }
  0x1b   : > { %p11_p4 = scmp.ge.s32.totalorder %s14_s15, 4  }
  0x1d   :  { %13 = sbr.rel (!%p11_p4) target bundleno = 1 (0x1), region = 69 }

</bundles_post_ra>
